<compile_context>
chip_gen: v5e
topology: v5e:2x2
jax: 0.10.0
libtpu: 0.0.40
codegen_flags: <defaults>
</compile_context>

<pallas_src>
import functools

import numpy as np
import jax
import jax.numpy as jnp
from jax.experimental import pallas as pl
from jax.experimental.pallas import tpu as pltpu


# ----------------------------------------------------------------------------
# In-kernel helpers
# ----------------------------------------------------------------------------
def _softplus(x):
    # matches torch.nn.Softplus(beta=1, threshold=20); exp/log1p go to the EUP
    return jnp.where(x > 20.0, x, jnp.log1p(jnp.exp(jnp.minimum(x, 20.0))))


def _shift_lanes(x, k):
    """out[:, i] = x[:, (i + k) % L]  (static circular shift along lanes)."""
    L = x.shape[-1]
    k = k % L
    if k == 0:
        return x
    return jnp.concatenate([x[:, k:], x[:, :k]], axis=-1)


# tap order must match _conv_w_cf / _near_masks (dy-major, then dx)
_OFFSETS = tuple((dy, dx) for dy in (-1, 0, 1) for dx in (-1, 0, 1))


# ----------------------------------------------------------------------------
# The single fused kernel (grid = (batch,); one full forward per grid step)
# ----------------------------------------------------------------------------
def _make_fused_kernel(iterations, H, W):
    del H  # only W is needed for the flattened-index shift arithmetic

    def kernel(cols0_ref, colsfb_ref, masks_ref,
               wff_ref, bff_ref, wfb_ref, bfb_ref, wnr_ref, bnr_ref,
               rosp_ref, roch_ref, rob_ref, out_ref):
        cols0 = cols0_ref[0]        # (9*Cin0, HW)  im2col of base[0]
        colsfb = colsfb_ref[0]      # (Kfb,    HW)  upsample-folded im2col of base[1:]
        masks = masks_ref[...]      # (9, HW)       validity masks for the 9 taps
        rosp = rosp_ref[...]        # (HW, N)
        roch = roch_ref[...]        # (C, N)
        rob = rob_ref[...]          # (1, N)
        wnr = wnr_ref[...]          # (C, 9*C)

        # -- feedforward conv (single K=9*Cin matmul) + softplus -> (C, HW) ---
        conv_out = _softplus(
            jnp.dot(wff_ref[...], cols0, preferred_element_type=jnp.float32)
            + bff_ref[...])

        # -- far-surround feedback: iteration-invariant, both branches in one
        #    matmul; near-conv bias folded in once (it is added every step) ---
        fb_plus = (jnp.dot(wfb_ref[...], colsfb,
                           preferred_element_type=jnp.float32)
                   + bfb_ref[...] + bnr_ref[...])

        def readout(co):
            # factorized readout: (C,HW)@(HW,N) then channel contraction.
            # downscale == 1 -> MaxPool2d(1,1) is the identity.
            u = jnp.dot(co, rosp, preferred_element_type=jnp.float32)   # (C, N)
            y = jnp.sum(u * roch, axis=0, keepdims=True) + rob          # (1, N)
            return _softplus(y)

        ys = [readout(conv_out)]
        for _ in range(1, iterations):
            # near-surround conv: build shifted/masked stack -> one K=9*C matmul
            blocks = []
            for t, (dy, dx) in enumerate(_OFFSETS):
                v = _shift_lanes(conv_out, dy * W + dx)
                if (dy, dx) != (0, 0):
                    v = v * masks[t:t + 1, :]
                blocks.append(v)
            stacked = jnp.concatenate(blocks, axis=0)                   # (9C, HW)
            near = jnp.dot(wnr, stacked, preferred_element_type=jnp.float32)
            conv_out = _softplus(conv_out + near + fb_plus)
            ys.append(readout(conv_out))

        out_ref[0] = jnp.concatenate(ys, axis=0) if iterations > 1 else ys[0]

    return kernel


# ----------------------------------------------------------------------------
# Wrapper-side (iteration-invariant) preprocessing
# ----------------------------------------------------------------------------
def _im2col_cf(x_nhwc, k=3):
    """(B,H,W,Cin) -> (B, k*k*Cin, H*W), tap-major then cin (channels-first)."""
    B, H, W, Cin = x_nhwc.shape
    p = k // 2
    xp = jnp.pad(x_nhwc, ((0, 0), (p, p), (p, p), (0, 0)))
    patches = [xp[:, dy:dy + H, dx:dx + W, :]
               for dy in range(k) for dx in range(k)]           # each (B,H,W,Cin)
    cols = jnp.stack(patches, axis=1)                           # (B,k*k,H,W,Cin)
    cols = jnp.transpose(cols, (0, 1, 4, 2, 3))                 # (B,k*k,Cin,H,W)
    return cols.reshape(B, k * k * Cin, H * W)


def _conv_w_cf(w):
    """(k,k,Cin,Cout) -> (Cout, k*k*Cin), matching _im2col_cf / _OFFSETS order."""
    kh, kw, cin, cout = w.shape
    return jnp.transpose(w, (3, 0, 1, 2)).reshape(cout, kh * kw * cin)


def _near_masks(H, W):
    """(9, H*W) validity masks for the 9 recurrent-conv taps (zero padding)."""
    yy, xx = np.meshgrid(np.arange(H), np.arange(W), indexing="ij")
    m = np.zeros((9, H * W), np.float32)
    for t, (dy, dx) in enumerate(_OFFSETS):
        valid = ((yy + dy >= 0) & (yy + dy < H) &
                 (xx + dx >= 0) & (xx + dx < W))
        m[t] = valid.reshape(-1).astype(np.float32)
    return jnp.asarray(m)


def _bilinear_matrix(out_size, in_size):
    """Matrix M (out^2, in^2) s.t. upsample(x).flat = M @ x.flat.
    Matches torch.nn.Upsample(mode='bilinear', align_corners=False)."""
    scale = in_size / out_size
    U = np.zeros((out_size, in_size), np.float32)
    for o in range(out_size):
        src = (o + 0.5) * scale - 0.5
        if src < 0.0:
            src = 0.0
        i0 = int(np.floor(src))
        i1 = min(i0 + 1, in_size - 1)
        f = src - i0
        U[o, i0] += 1.0 - f
        U[o, i1] += f
    M = np.einsum("oi,pw->opiw", U, U).reshape(out_size * out_size,
                                               in_size * in_size)
    return jnp.asarray(M)


def _synthetic_base(x_nhwc):
    """Stand-in for base_transform: [x, avgpool2(x), avgpool4(x)] (NHWC)."""
    B, H, W, C = x_nhwc.shape
    b1 = x_nhwc.reshape(B, H // 2, 2, W // 2, 2, C).mean(axis=(2, 4))
    b2 = x_nhwc.reshape(B, H // 4, 4, W // 4, 4, C).mean(axis=(2, 4))
    return [x_nhwc, b1, b2]


def init_params(key, trans_out_channels, conv_out_channels, out_neurons, size0):
    ks = jax.random.split(key, 12)
    cc = conv_out_channels

    def conv_w(k, cin, cout):
        return 0.1 * jax.random.normal(k, (3, 3, cin, cout), jnp.float32)

    params = {
        "ff_w": conv_w(ks[0], trans_out_channels[0], cc),
        "ff_b": 0.01 * jax.random.normal(ks[1], (1, cc), jnp.float32),
        "fb_w": [conv_w(ks[2], trans_out_channels[1], cc),
                 conv_w(ks[3], trans_out_channels[2], cc)],
        "fb_b": [0.01 * jax.random.normal(ks[4], (1, cc), jnp.float32),
                 0.01 * jax.random.normal(ks[5], (1, cc), jnp.float32)],
        "near_w": conv_w(ks[6], cc, cc),
        "near_b": 0.01 * jax.random.normal(ks[7], (1, cc), jnp.float32),
        # factorized readout: spatial (S*S, N), channel (C, N), bias (1, N)
        "ro_sp": 0.1 * jax.random.normal(ks[8], (size0 * size0, out_neurons),
                                         jnp.float32),
        "ro_ch": 0.1 * jax.random.normal(ks[9], (cc, out_neurons), jnp.float32),
        "ro_b": 0.01 * jax.random.normal(ks[10], (1, out_neurons), jnp.float32),
    }
    return params


# ----------------------------------------------------------------------------
# Forward
# ----------------------------------------------------------------------------
@functools.partial(jax.jit, static_argnames=("trans_out_sizes", "iterations"))
def far_near_surround_forward(params, x_nchw, *, trans_out_sizes, iterations):
    """Equivalent of FarNearSurroundTransfer.forward (downscale=1, p_dropout=0).

    x_nchw: (B, C, H, W) like PyTorch.  Returns (B, out_neurons, iterations)."""
    x = jnp.transpose(x_nchw, (0, 2, 3, 1)).astype(jnp.float32)   # NHWC
    base = _synthetic_base(x)

    B = x.shape[0]
    S0 = trans_out_sizes[0]
    HW = S0 * S0
    C = params["near_w"].shape[-1]
    N = params["ro_ch"].shape[-1]

    # ---- iteration-invariant preprocessing (cheap glue, fused by XLA) ----
    cols0 = _im2col_cf(base[0])                          # (B, 9*Cin0, HW)

    cols_fb, wfb = [], []
    bfb = jnp.zeros((C, 1), jnp.float32)
    for j in range(len(params["fb_w"])):
        Sj = trans_out_sizes[j + 1]
        M = _bilinear_matrix(S0, Sj)                     # (HW, Sj*Sj)
        cj = _im2col_cf(base[j + 1])                     # (B, 9*Cinj, Sj*Sj)
        cols_fb.append(jnp.einsum("pq,bkq->bkp", M, cj))  # upsample folded in
        wfb.append(_conv_w_cf(params["fb_w"][j]))
        bfb = bfb + params["fb_b"][j].reshape(C, 1)
    cols_fb = jnp.concatenate(cols_fb, axis=1)           # (B, Kfb, HW)
    wfb = jnp.concatenate(wfb, axis=1)                   # (C, Kfb)

    wff = _conv_w_cf(params["ff_w"])                     # (C, 9*Cin0)
    bff = params["ff_b"].reshape(C, 1)
    wnr = _conv_w_cf(params["near_w"])                   # (C, 9*C)
    bnr = params["near_b"].reshape(C, 1)
    masks = _near_masks(S0, S0)                          # (9, HW)

    K0 = cols0.shape[1]
    Kfb = cols_fb.shape[1]

    kernel = _make_fused_kernel(iterations, S0, S0)
    out = pl.pallas_call(
        kernel,
        out_shape=jax.ShapeDtypeStruct((B, iterations, N), jnp.float32),
        grid=(B,),
        in_specs=[
            pl.BlockSpec((1, K0, HW), lambda b: (b, 0, 0)),      # cols0
            pl.BlockSpec((1, Kfb, HW), lambda b: (b, 0, 0)),     # cols_fb
            pl.BlockSpec((9, HW), lambda b: (0, 0)),             # masks
            pl.BlockSpec((C, K0), lambda b: (0, 0)),             # wff
            pl.BlockSpec((C, 1), lambda b: (0, 0)),              # bff
            pl.BlockSpec((C, Kfb), lambda b: (0, 0)),            # wfb
            pl.BlockSpec((C, 1), lambda b: (0, 0)),              # bfb
            pl.BlockSpec((C, 9 * C), lambda b: (0, 0)),          # wnr
            pl.BlockSpec((C, 1), lambda b: (0, 0)),              # bnr
            pl.BlockSpec((HW, N), lambda b: (0, 0)),             # ro_sp
            pl.BlockSpec((C, N), lambda b: (0, 0)),              # ro_ch
            pl.BlockSpec((1, N), lambda b: (0, 0)),              # ro_b
        ],
        out_specs=pl.BlockSpec((1, iterations, N), lambda b: (b, 0, 0)),
        compiler_params=pltpu.CompilerParams(dimension_semantics=("parallel",)),
    )(cols0, cols_fb, masks, wff, bff, wfb, bfb, wnr, bnr,
      params["ro_sp"], params["ro_ch"], params["ro_b"])

    return jnp.transpose(out, (0, 2, 1))                 # (B, N, iterations)


# ----------------------------------------------------------------------------
if __name__ == "__main__":
    B, C_IN, S = 2, 4, 16
    trans_out_sizes = (16, 8, 4)
    trans_out_channels = [4, 4, 4]
    conv_out_channels = 8
    out_neurons = 10
    iterations = 3

    key = jax.random.PRNGKey(0)
    kx, kp = jax.random.split(key)
    x = jax.random.normal(kx, (B, C_IN, S, S), jnp.float32)     # NCHW like torch
    params = init_params(kp, trans_out_channels, conv_out_channels,
                         out_neurons, trans_out_sizes[0])

    out = far_near_surround_forward(params, x,
                                    trans_out_sizes=trans_out_sizes,
                                    iterations=iterations)
    out = jax.block_until_ready(out)
    assert out.shape == (B, out_neurons, iterations), out.shape
    assert bool(jnp.all(jnp.isfinite(out)))
    print("KERNEL_OK")
</pallas_src>

<mosaic_0001>
module attributes {stable_mosaic.version = 11 : i64} {
  func.func @kernel(%arg0: i32, %arg1: memref<1x36x256xf32, #tpu.memory_space<vmem>>, %arg2: memref<1x72x256xf32, #tpu.memory_space<vmem>>, %arg3: memref<9x256xf32, #tpu.memory_space<vmem>>, %arg4: memref<8x36xf32, #tpu.memory_space<vmem>>, %arg5: memref<8x1xf32, #tpu.memory_space<vmem>>, %arg6: memref<8x72xf32, #tpu.memory_space<vmem>>, %arg7: memref<8x1xf32, #tpu.memory_space<vmem>>, %arg8: memref<8x72xf32, #tpu.memory_space<vmem>>, %arg9: memref<8x1xf32, #tpu.memory_space<vmem>>, %arg10: memref<256x10xf32, #tpu.memory_space<vmem>>, %arg11: memref<8x10xf32, #tpu.memory_space<vmem>>, %arg12: memref<1x10xf32, #tpu.memory_space<vmem>>, %arg13: memref<1x3x10xf32, #tpu.memory_space<vmem>>) attributes {dimension_semantics = [#tpu.dimension_semantics<parallel>], iteration_bounds = array<i64: 2>, scalar_prefetch = 0 : i64, scratch_operands = 0 : i64, tpu.core_type = #tpu.core_type<tc>, window_params = [{transform_indices = @transform_0, window_bounds = array<i64: 1, 36, 256>}, {transform_indices = @transform_1, window_bounds = array<i64: 1, 72, 256>}, {pipeline_mode = #tpu.pipeline_mode<synchronous>, transform_indices = @transform_2, window_bounds = array<i64: 9, 256>}, {pipeline_mode = #tpu.pipeline_mode<synchronous>, transform_indices = @transform_3, window_bounds = array<i64: 8, 36>}, {pipeline_mode = #tpu.pipeline_mode<synchronous>, transform_indices = @transform_4, window_bounds = array<i64: 8, 1>}, {pipeline_mode = #tpu.pipeline_mode<synchronous>, transform_indices = @transform_5, window_bounds = array<i64: 8, 72>}, {pipeline_mode = #tpu.pipeline_mode<synchronous>, transform_indices = @transform_6, window_bounds = array<i64: 8, 1>}, {pipeline_mode = #tpu.pipeline_mode<synchronous>, transform_indices = @transform_7, window_bounds = array<i64: 8, 72>}, {pipeline_mode = #tpu.pipeline_mode<synchronous>, transform_indices = @transform_8, window_bounds = array<i64: 8, 1>}, {pipeline_mode = #tpu.pipeline_mode<synchronous>, transform_indices = @transform_9, window_bounds = array<i64: 256, 10>}, {pipeline_mode = #tpu.pipeline_mode<synchronous>, transform_indices = @transform_10, window_bounds = array<i64: 8, 10>}, {pipeline_mode = #tpu.pipeline_mode<synchronous>, transform_indices = @transform_11, window_bounds = array<i64: 1, 10>}, {transform_indices = @transform_12, window_bounds = array<i64: 1, 3, 10>}]} {
    %c0 = arith.constant 0 : index
    %c0_0 = arith.constant 0 : index
    %c0_1 = arith.constant 0 : index
    %0 = vector.load %arg1[%c0, %c0_0, %c0_1] : memref<1x36x256xf32, #tpu.memory_space<vmem>>, vector<1x36x256xf32>
    %1 = vector.shape_cast %0 : vector<1x36x256xf32> to vector<36x256xf32>
    %c0_2 = arith.constant 0 : index
    %c0_3 = arith.constant 0 : index
    %c0_4 = arith.constant 0 : index
    %2 = vector.load %arg2[%c0_2, %c0_3, %c0_4] : memref<1x72x256xf32, #tpu.memory_space<vmem>>, vector<1x72x256xf32>
    %3 = vector.shape_cast %2 : vector<1x72x256xf32> to vector<72x256xf32>
    %c0_5 = arith.constant 0 : index
    %c0_6 = arith.constant 0 : index
    %4 = vector.load %arg3[%c0_5, %c0_6] : memref<9x256xf32, #tpu.memory_space<vmem>>, vector<9x256xf32>
    %c0_7 = arith.constant 0 : index
    %c0_8 = arith.constant 0 : index
    %5 = vector.load %arg10[%c0_7, %c0_8] : memref<256x10xf32, #tpu.memory_space<vmem>>, vector<256x10xf32>
    %c0_9 = arith.constant 0 : index
    %c0_10 = arith.constant 0 : index
    %6 = vector.load %arg11[%c0_9, %c0_10] : memref<8x10xf32, #tpu.memory_space<vmem>>, vector<8x10xf32>
    %c0_11 = arith.constant 0 : index
    %c0_12 = arith.constant 0 : index
    %7 = vector.load %arg12[%c0_11, %c0_12] : memref<1x10xf32, #tpu.memory_space<vmem>>, vector<1x10xf32>
    %c0_13 = arith.constant 0 : index
    %c0_14 = arith.constant 0 : index
    %8 = vector.load %arg8[%c0_13, %c0_14] : memref<8x72xf32, #tpu.memory_space<vmem>>, vector<8x72xf32>
    %c0_15 = arith.constant 0 : index
    %c0_16 = arith.constant 0 : index
    %9 = vector.load %arg4[%c0_15, %c0_16] : memref<8x36xf32, #tpu.memory_space<vmem>>, vector<8x36xf32>
    %cst = arith.constant dense<0.000000e+00> : vector<8x256xf32>
    %10 = tpu.matmul %9, %1, %cst {dimension_numbers = #tpu.dot_dimension_numbers<[1], [0], [0], [1], [0, 0, 1, 1], [], []>} : vector<8x36xf32>, vector<36x256xf32>, vector<8x256xf32> -> vector<8x256xf32>
    %c0_17 = arith.constant 0 : index
    %c0_18 = arith.constant 0 : index
    %11 = vector.load %arg5[%c0_17, %c0_18] : memref<8x1xf32, #tpu.memory_space<vmem>>, vector<8x1xf32>
    %12 = vector.broadcast %11 : vector<8x1xf32> to vector<8x256xf32>
    %13 = arith.addf %10, %12 : vector<8x256xf32>
    %cst_19 = arith.constant 2.000000e+01 : f32
    %14 = vector.broadcast %cst_19 : f32 to vector<8x256xf32>
    %15 = arith.cmpf ogt, %13, %14 : vector<8x256xf32>
    %cst_20 = arith.constant 2.000000e+01 : f32
    %16 = vector.broadcast %cst_20 : f32 to vector<8x256xf32>
    %17 = arith.minimumf %13, %16 : vector<8x256xf32>
    %18 = math.exp %17 : vector<8x256xf32>
    %19 = math.log1p %18 : vector<8x256xf32>
    %20 = arith.select %15, %13, %19 : vector<8x256xi1>, vector<8x256xf32>
    %c0_21 = arith.constant 0 : index
    %c0_22 = arith.constant 0 : index
    %21 = vector.load %arg6[%c0_21, %c0_22] : memref<8x72xf32, #tpu.memory_space<vmem>>, vector<8x72xf32>
    %cst_23 = arith.constant dense<0.000000e+00> : vector<8x256xf32>
    %22 = tpu.matmul %21, %3, %cst_23 {dimension_numbers = #tpu.dot_dimension_numbers<[1], [0], [0], [1], [0, 0, 1, 1], [], []>} : vector<8x72xf32>, vector<72x256xf32>, vector<8x256xf32> -> vector<8x256xf32>
    %c0_24 = arith.constant 0 : index
    %c0_25 = arith.constant 0 : index
    %23 = vector.load %arg7[%c0_24, %c0_25] : memref<8x1xf32, #tpu.memory_space<vmem>>, vector<8x1xf32>
    %24 = vector.broadcast %23 : vector<8x1xf32> to vector<8x256xf32>
    %25 = arith.addf %22, %24 : vector<8x256xf32>
    %c0_26 = arith.constant 0 : index
    %c0_27 = arith.constant 0 : index
    %26 = vector.load %arg9[%c0_26, %c0_27] : memref<8x1xf32, #tpu.memory_space<vmem>>, vector<8x1xf32>
    %27 = vector.broadcast %26 : vector<8x1xf32> to vector<8x256xf32>
    %28 = arith.addf %25, %27 : vector<8x256xf32>
    %cst_28 = arith.constant dense<0.000000e+00> : vector<8x10xf32>
    %29 = tpu.matmul %20, %5, %cst_28 {dimension_numbers = #tpu.dot_dimension_numbers<[1], [0], [0], [1], [0, 0, 1, 1], [], []>} : vector<8x256xf32>, vector<256x10xf32>, vector<8x10xf32> -> vector<8x10xf32>
    %30 = arith.mulf %29, %6 : vector<8x10xf32>
    %cst_29 = arith.constant dense<0.000000e+00> : vector<10xf32>
    %31 = vector.multi_reduction <add>, %30, %cst_29 [0] : vector<8x10xf32> to vector<10xf32>
    %32 = vector.shape_cast %31 : vector<10xf32> to vector<1x10xf32>
    %33 = arith.addf %32, %7 : vector<1x10xf32>
    %cst_30 = arith.constant 2.000000e+01 : f32
    %34 = vector.broadcast %cst_30 : f32 to vector<1x10xf32>
    %35 = arith.cmpf ogt, %33, %34 : vector<1x10xf32>
    %cst_31 = arith.constant 2.000000e+01 : f32
    %36 = vector.broadcast %cst_31 : f32 to vector<1x10xf32>
    %37 = arith.minimumf %33, %36 : vector<1x10xf32>
    %38 = math.exp %37 : vector<1x10xf32>
    %39 = math.log1p %38 : vector<1x10xf32>
    %40 = arith.select %35, %33, %39 : vector<1x10xi1>, vector<1x10xf32>
    %41 = vector.extract_strided_slice %20 {offsets = [0, 239], sizes = [8, 17], strides = [1, 1]} : vector<8x256xf32> to vector<8x17xf32>
    %42 = vector.extract_strided_slice %20 {offsets = [0, 0], sizes = [8, 239], strides = [1, 1]} : vector<8x256xf32> to vector<8x239xf32>
    %43 = tpu.concatenate %41, %42 in 1 : vector<8x17xf32>, vector<8x239xf32> -> vector<8x256xf32>
    %44 = vector.extract_strided_slice %4 {offsets = [0, 0], sizes = [1, 256], strides = [1, 1]} : vector<9x256xf32> to vector<1x256xf32>
    %45 = vector.broadcast %44 : vector<1x256xf32> to vector<8x256xf32>
    %46 = arith.mulf %43, %45 : vector<8x256xf32>
    %47 = vector.extract_strided_slice %20 {offsets = [0, 240], sizes = [8, 16], strides = [1, 1]} : vector<8x256xf32> to vector<8x16xf32>
    %48 = vector.extract_strided_slice %20 {offsets = [0, 0], sizes = [8, 240], strides = [1, 1]} : vector<8x256xf32> to vector<8x240xf32>
    %49 = tpu.concatenate %47, %48 in 1 : vector<8x16xf32>, vector<8x240xf32> -> vector<8x256xf32>
    %50 = vector.extract_strided_slice %4 {offsets = [1, 0], sizes = [1, 256], strides = [1, 1]} : vector<9x256xf32> to vector<1x256xf32>
    %51 = vector.broadcast %50 : vector<1x256xf32> to vector<8x256xf32>
    %52 = arith.mulf %49, %51 : vector<8x256xf32>
    %53 = vector.extract_strided_slice %20 {offsets = [0, 241], sizes = [8, 15], strides = [1, 1]} : vector<8x256xf32> to vector<8x15xf32>
    %54 = vector.extract_strided_slice %20 {offsets = [0, 0], sizes = [8, 241], strides = [1, 1]} : vector<8x256xf32> to vector<8x241xf32>
    %55 = tpu.concatenate %53, %54 in 1 : vector<8x15xf32>, vector<8x241xf32> -> vector<8x256xf32>
    %56 = vector.extract_strided_slice %4 {offsets = [2, 0], sizes = [1, 256], strides = [1, 1]} : vector<9x256xf32> to vector<1x256xf32>
    %57 = vector.broadcast %56 : vector<1x256xf32> to vector<8x256xf32>
    %58 = arith.mulf %55, %57 : vector<8x256xf32>
    %59 = vector.extract_strided_slice %20 {offsets = [0, 255], sizes = [8, 1], strides = [1, 1]} : vector<8x256xf32> to vector<8x1xf32>
    %60 = vector.extract_strided_slice %20 {offsets = [0, 0], sizes = [8, 255], strides = [1, 1]} : vector<8x256xf32> to vector<8x255xf32>
    %61 = tpu.concatenate %59, %60 in 1 : vector<8x1xf32>, vector<8x255xf32> -> vector<8x256xf32>
    %62 = vector.extract_strided_slice %4 {offsets = [3, 0], sizes = [1, 256], strides = [1, 1]} : vector<9x256xf32> to vector<1x256xf32>
    %63 = vector.broadcast %62 : vector<1x256xf32> to vector<8x256xf32>
    %64 = arith.mulf %61, %63 : vector<8x256xf32>
    %65 = vector.extract_strided_slice %20 {offsets = [0, 1], sizes = [8, 255], strides = [1, 1]} : vector<8x256xf32> to vector<8x255xf32>
    %66 = vector.extract_strided_slice %20 {offsets = [0, 0], sizes = [8, 1], strides = [1, 1]} : vector<8x256xf32> to vector<8x1xf32>
    %67 = tpu.concatenate %65, %66 in 1 : vector<8x255xf32>, vector<8x1xf32> -> vector<8x256xf32>
    %68 = vector.extract_strided_slice %4 {offsets = [5, 0], sizes = [1, 256], strides = [1, 1]} : vector<9x256xf32> to vector<1x256xf32>
    %69 = vector.broadcast %68 : vector<1x256xf32> to vector<8x256xf32>
    %70 = arith.mulf %67, %69 : vector<8x256xf32>
    %71 = vector.extract_strided_slice %20 {offsets = [0, 15], sizes = [8, 241], strides = [1, 1]} : vector<8x256xf32> to vector<8x241xf32>
    %72 = vector.extract_strided_slice %20 {offsets = [0, 0], sizes = [8, 15], strides = [1, 1]} : vector<8x256xf32> to vector<8x15xf32>
    %73 = tpu.concatenate %71, %72 in 1 : vector<8x241xf32>, vector<8x15xf32> -> vector<8x256xf32>
    %74 = vector.extract_strided_slice %4 {offsets = [6, 0], sizes = [1, 256], strides = [1, 1]} : vector<9x256xf32> to vector<1x256xf32>
    %75 = vector.broadcast %74 : vector<1x256xf32> to vector<8x256xf32>
    %76 = arith.mulf %73, %75 : vector<8x256xf32>
    %77 = vector.extract_strided_slice %20 {offsets = [0, 16], sizes = [8, 240], strides = [1, 1]} : vector<8x256xf32> to vector<8x240xf32>
    %78 = vector.extract_strided_slice %20 {offsets = [0, 0], sizes = [8, 16], strides = [1, 1]} : vector<8x256xf32> to vector<8x16xf32>
    %79 = tpu.concatenate %77, %78 in 1 : vector<8x240xf32>, vector<8x16xf32> -> vector<8x256xf32>
    %80 = vector.extract_strided_slice %4 {offsets = [7, 0], sizes = [1, 256], strides = [1, 1]} : vector<9x256xf32> to vector<1x256xf32>
    %81 = vector.broadcast %80 : vector<1x256xf32> to vector<8x256xf32>
    %82 = arith.mulf %79, %81 : vector<8x256xf32>
    %83 = vector.extract_strided_slice %20 {offsets = [0, 17], sizes = [8, 239], strides = [1, 1]} : vector<8x256xf32> to vector<8x239xf32>
    %84 = vector.extract_strided_slice %20 {offsets = [0, 0], sizes = [8, 17], strides = [1, 1]} : vector<8x256xf32> to vector<8x17xf32>
    %85 = tpu.concatenate %83, %84 in 1 : vector<8x239xf32>, vector<8x17xf32> -> vector<8x256xf32>
    %86 = vector.extract_strided_slice %4 {offsets = [8, 0], sizes = [1, 256], strides = [1, 1]} : vector<9x256xf32> to vector<1x256xf32>
    %87 = vector.broadcast %86 : vector<1x256xf32> to vector<8x256xf32>
    %88 = arith.mulf %85, %87 : vector<8x256xf32>
    %89 = tpu.concatenate %46, %52, %58, %64, %20, %70, %76, %82, %88 in 0 : vector<8x256xf32>, vector<8x256xf32>, vector<8x256xf32>, vector<8x256xf32>, vector<8x256xf32>, vector<8x256xf32>, vector<8x256xf32>, vector<8x256xf32>, vector<8x256xf32> -> vector<72x256xf32>
    %cst_32 = arith.constant dense<0.000000e+00> : vector<8x256xf32>
    %90 = tpu.matmul %8, %89, %cst_32 {dimension_numbers = #tpu.dot_dimension_numbers<[1], [0], [0], [1], [0, 0, 1, 1], [], []>} : vector<8x72xf32>, vector<72x256xf32>, vector<8x256xf32> -> vector<8x256xf32>
    %91 = arith.addf %20, %90 : vector<8x256xf32>
    %92 = arith.addf %91, %28 : vector<8x256xf32>
    %cst_33 = arith.constant 2.000000e+01 : f32
    %93 = vector.broadcast %cst_33 : f32 to vector<8x256xf32>
    %94 = arith.cmpf ogt, %92, %93 : vector<8x256xf32>
    %cst_34 = arith.constant 2.000000e+01 : f32
    %95 = vector.broadcast %cst_34 : f32 to vector<8x256xf32>
    %96 = arith.minimumf %92, %95 : vector<8x256xf32>
    %97 = math.exp %96 : vector<8x256xf32>
    %98 = math.log1p %97 : vector<8x256xf32>
    %99 = arith.select %94, %92, %98 : vector<8x256xi1>, vector<8x256xf32>
    %cst_35 = arith.constant dense<0.000000e+00> : vector<8x10xf32>
    %100 = tpu.matmul %99, %5, %cst_35 {dimension_numbers = #tpu.dot_dimension_numbers<[1], [0], [0], [1], [0, 0, 1, 1], [], []>} : vector<8x256xf32>, vector<256x10xf32>, vector<8x10xf32> -> vector<8x10xf32>
    %101 = arith.mulf %100, %6 : vector<8x10xf32>
    %cst_36 = arith.constant dense<0.000000e+00> : vector<10xf32>
    %102 = vector.multi_reduction <add>, %101, %cst_36 [0] : vector<8x10xf32> to vector<10xf32>
    %103 = vector.shape_cast %102 : vector<10xf32> to vector<1x10xf32>
    %104 = arith.addf %103, %7 : vector<1x10xf32>
    %cst_37 = arith.constant 2.000000e+01 : f32
    %105 = vector.broadcast %cst_37 : f32 to vector<1x10xf32>
    %106 = arith.cmpf ogt, %104, %105 : vector<1x10xf32>
    %cst_38 = arith.constant 2.000000e+01 : f32
    %107 = vector.broadcast %cst_38 : f32 to vector<1x10xf32>
    %108 = arith.minimumf %104, %107 : vector<1x10xf32>
    %109 = math.exp %108 : vector<1x10xf32>
    %110 = math.log1p %109 : vector<1x10xf32>
    %111 = arith.select %106, %104, %110 : vector<1x10xi1>, vector<1x10xf32>
    %112 = vector.extract_strided_slice %99 {offsets = [0, 239], sizes = [8, 17], strides = [1, 1]} : vector<8x256xf32> to vector<8x17xf32>
    %113 = vector.extract_strided_slice %99 {offsets = [0, 0], sizes = [8, 239], strides = [1, 1]} : vector<8x256xf32> to vector<8x239xf32>
    %114 = tpu.concatenate %112, %113 in 1 : vector<8x17xf32>, vector<8x239xf32> -> vector<8x256xf32>
    %115 = vector.extract_strided_slice %4 {offsets = [0, 0], sizes = [1, 256], strides = [1, 1]} : vector<9x256xf32> to vector<1x256xf32>
    %116 = vector.broadcast %115 : vector<1x256xf32> to vector<8x256xf32>
    %117 = arith.mulf %114, %116 : vector<8x256xf32>
    %118 = vector.extract_strided_slice %99 {offsets = [0, 240], sizes = [8, 16], strides = [1, 1]} : vector<8x256xf32> to vector<8x16xf32>
    %119 = vector.extract_strided_slice %99 {offsets = [0, 0], sizes = [8, 240], strides = [1, 1]} : vector<8x256xf32> to vector<8x240xf32>
    %120 = tpu.concatenate %118, %119 in 1 : vector<8x16xf32>, vector<8x240xf32> -> vector<8x256xf32>
    %121 = vector.extract_strided_slice %4 {offsets = [1, 0], sizes = [1, 256], strides = [1, 1]} : vector<9x256xf32> to vector<1x256xf32>
    %122 = vector.broadcast %121 : vector<1x256xf32> to vector<8x256xf32>
    %123 = arith.mulf %120, %122 : vector<8x256xf32>
    %124 = vector.extract_strided_slice %99 {offsets = [0, 241], sizes = [8, 15], strides = [1, 1]} : vector<8x256xf32> to vector<8x15xf32>
    %125 = vector.extract_strided_slice %99 {offsets = [0, 0], sizes = [8, 241], strides = [1, 1]} : vector<8x256xf32> to vector<8x241xf32>
    %126 = tpu.concatenate %124, %125 in 1 : vector<8x15xf32>, vector<8x241xf32> -> vector<8x256xf32>
    %127 = vector.extract_strided_slice %4 {offsets = [2, 0], sizes = [1, 256], strides = [1, 1]} : vector<9x256xf32> to vector<1x256xf32>
    %128 = vector.broadcast %127 : vector<1x256xf32> to vector<8x256xf32>
    %129 = arith.mulf %126, %128 : vector<8x256xf32>
    %130 = vector.extract_strided_slice %99 {offsets = [0, 255], sizes = [8, 1], strides = [1, 1]} : vector<8x256xf32> to vector<8x1xf32>
    %131 = vector.extract_strided_slice %99 {offsets = [0, 0], sizes = [8, 255], strides = [1, 1]} : vector<8x256xf32> to vector<8x255xf32>
    %132 = tpu.concatenate %130, %131 in 1 : vector<8x1xf32>, vector<8x255xf32> -> vector<8x256xf32>
    %133 = vector.extract_strided_slice %4 {offsets = [3, 0], sizes = [1, 256], strides = [1, 1]} : vector<9x256xf32> to vector<1x256xf32>
    %134 = vector.broadcast %133 : vector<1x256xf32> to vector<8x256xf32>
    %135 = arith.mulf %132, %134 : vector<8x256xf32>
    %136 = vector.extract_strided_slice %99 {offsets = [0, 1], sizes = [8, 255], strides = [1, 1]} : vector<8x256xf32> to vector<8x255xf32>
    %137 = vector.extract_strided_slice %99 {offsets = [0, 0], sizes = [8, 1], strides = [1, 1]} : vector<8x256xf32> to vector<8x1xf32>
    %138 = tpu.concatenate %136, %137 in 1 : vector<8x255xf32>, vector<8x1xf32> -> vector<8x256xf32>
    %139 = vector.extract_strided_slice %4 {offsets = [5, 0], sizes = [1, 256], strides = [1, 1]} : vector<9x256xf32> to vector<1x256xf32>
    %140 = vector.broadcast %139 : vector<1x256xf32> to vector<8x256xf32>
    %141 = arith.mulf %138, %140 : vector<8x256xf32>
    %142 = vector.extract_strided_slice %99 {offsets = [0, 15], sizes = [8, 241], strides = [1, 1]} : vector<8x256xf32> to vector<8x241xf32>
    %143 = vector.extract_strided_slice %99 {offsets = [0, 0], sizes = [8, 15], strides = [1, 1]} : vector<8x256xf32> to vector<8x15xf32>
    %144 = tpu.concatenate %142, %143 in 1 : vector<8x241xf32>, vector<8x15xf32> -> vector<8x256xf32>
    %145 = vector.extract_strided_slice %4 {offsets = [6, 0], sizes = [1, 256], strides = [1, 1]} : vector<9x256xf32> to vector<1x256xf32>
    %146 = vector.broadcast %145 : vector<1x256xf32> to vector<8x256xf32>
    %147 = arith.mulf %144, %146 : vector<8x256xf32>
    %148 = vector.extract_strided_slice %99 {offsets = [0, 16], sizes = [8, 240], strides = [1, 1]} : vector<8x256xf32> to vector<8x240xf32>
    %149 = vector.extract_strided_slice %99 {offsets = [0, 0], sizes = [8, 16], strides = [1, 1]} : vector<8x256xf32> to vector<8x16xf32>
    %150 = tpu.concatenate %148, %149 in 1 : vector<8x240xf32>, vector<8x16xf32> -> vector<8x256xf32>
    %151 = vector.extract_strided_slice %4 {offsets = [7, 0], sizes = [1, 256], strides = [1, 1]} : vector<9x256xf32> to vector<1x256xf32>
    %152 = vector.broadcast %151 : vector<1x256xf32> to vector<8x256xf32>
    %153 = arith.mulf %150, %152 : vector<8x256xf32>
    %154 = vector.extract_strided_slice %99 {offsets = [0, 17], sizes = [8, 239], strides = [1, 1]} : vector<8x256xf32> to vector<8x239xf32>
    %155 = vector.extract_strided_slice %99 {offsets = [0, 0], sizes = [8, 17], strides = [1, 1]} : vector<8x256xf32> to vector<8x17xf32>
    %156 = tpu.concatenate %154, %155 in 1 : vector<8x239xf32>, vector<8x17xf32> -> vector<8x256xf32>
    %157 = vector.extract_strided_slice %4 {offsets = [8, 0], sizes = [1, 256], strides = [1, 1]} : vector<9x256xf32> to vector<1x256xf32>
    %158 = vector.broadcast %157 : vector<1x256xf32> to vector<8x256xf32>
    %159 = arith.mulf %156, %158 : vector<8x256xf32>
    %160 = tpu.concatenate %117, %123, %129, %135, %99, %141, %147, %153, %159 in 0 : vector<8x256xf32>, vector<8x256xf32>, vector<8x256xf32>, vector<8x256xf32>, vector<8x256xf32>, vector<8x256xf32>, vector<8x256xf32>, vector<8x256xf32>, vector<8x256xf32> -> vector<72x256xf32>
    %cst_39 = arith.constant dense<0.000000e+00> : vector<8x256xf32>
    %161 = tpu.matmul %8, %160, %cst_39 {dimension_numbers = #tpu.dot_dimension_numbers<[1], [0], [0], [1], [0, 0, 1, 1], [], []>} : vector<8x72xf32>, vector<72x256xf32>, vector<8x256xf32> -> vector<8x256xf32>
    %162 = arith.addf %99, %161 : vector<8x256xf32>
    %163 = arith.addf %162, %28 : vector<8x256xf32>
    %cst_40 = arith.constant 2.000000e+01 : f32
    %164 = vector.broadcast %cst_40 : f32 to vector<8x256xf32>
    %165 = arith.cmpf ogt, %163, %164 : vector<8x256xf32>
    %cst_41 = arith.constant 2.000000e+01 : f32
    %166 = vector.broadcast %cst_41 : f32 to vector<8x256xf32>
    %167 = arith.minimumf %163, %166 : vector<8x256xf32>
    %168 = math.exp %167 : vector<8x256xf32>
    %169 = math.log1p %168 : vector<8x256xf32>
    %170 = arith.select %165, %163, %169 : vector<8x256xi1>, vector<8x256xf32>
    %cst_42 = arith.constant dense<0.000000e+00> : vector<8x10xf32>
    %171 = tpu.matmul %170, %5, %cst_42 {dimension_numbers = #tpu.dot_dimension_numbers<[1], [0], [0], [1], [0, 0, 1, 1], [], []>} : vector<8x256xf32>, vector<256x10xf32>, vector<8x10xf32> -> vector<8x10xf32>
    %172 = arith.mulf %171, %6 : vector<8x10xf32>
    %cst_43 = arith.constant dense<0.000000e+00> : vector<10xf32>
    %173 = vector.multi_reduction <add>, %172, %cst_43 [0] : vector<8x10xf32> to vector<10xf32>
    %174 = vector.shape_cast %173 : vector<10xf32> to vector<1x10xf32>
    %175 = arith.addf %174, %7 : vector<1x10xf32>
    %cst_44 = arith.constant 2.000000e+01 : f32
    %176 = vector.broadcast %cst_44 : f32 to vector<1x10xf32>
    %177 = arith.cmpf ogt, %175, %176 : vector<1x10xf32>
    %cst_45 = arith.constant 2.000000e+01 : f32
    %178 = vector.broadcast %cst_45 : f32 to vector<1x10xf32>
    %179 = arith.minimumf %175, %178 : vector<1x10xf32>
    %180 = math.exp %179 : vector<1x10xf32>
    %181 = math.log1p %180 : vector<1x10xf32>
    %182 = arith.select %177, %175, %181 : vector<1x10xi1>, vector<1x10xf32>
    %183 = tpu.concatenate %40, %111, %182 in 0 : vector<1x10xf32>, vector<1x10xf32>, vector<1x10xf32> -> vector<3x10xf32>
    %c0_46 = arith.constant 0 : index
    %c0_47 = arith.constant 0 : index
    %c0_48 = arith.constant 0 : index
    %184 = vector.load %arg13[%c0_46, %c0_47, %c0_48] : memref<1x3x10xf32, #tpu.memory_space<vmem>>, vector<1x3x10xf32>
    %185 = vector.shape_cast %184 : vector<1x3x10xf32> to vector<3x10xf32>
    %186 = vector.shape_cast %183 : vector<3x10xf32> to vector<1x3x10xf32>
    tpu.vector_store %arg13[%c0_46, %c0_47, %c0_48], %186 {strides = array<i32>} : memref<1x3x10xf32, #tpu.memory_space<vmem>>, vector<1x3x10xf32>,
    return
  }
  func.func @transform_0(%arg0: i32) -> (i32, i32, i32) {
    %c0_i32 = arith.constant 0 : i32
    %c0_i32_0 = arith.constant 0 : i32
    %c0_i32_1 = arith.constant 0 : i32
    return %arg0, %c0_i32, %c0_i32_0 : i32, i32, i32
  }
  func.func @transform_1(%arg0: i32) -> (i32, i32, i32) {
    %c0_i32 = arith.constant 0 : i32
    %c0_i32_0 = arith.constant 0 : i32
    %c0_i32_1 = arith.constant 0 : i32
    return %arg0, %c0_i32, %c0_i32_0 : i32, i32, i32
  }
  func.func @transform_2(%arg0: i32) -> (i32, i32) {
    %c0_i32 = arith.constant 0 : i32
    %c0_i32_0 = arith.constant 0 : i32
    %c0_i32_1 = arith.constant 0 : i32
    return %c0_i32, %c0_i32_0 : i32, i32
  }
  func.func @transform_3(%arg0: i32) -> (i32, i32) {
    %c0_i32 = arith.constant 0 : i32
    %c0_i32_0 = arith.constant 0 : i32
    %c0_i32_1 = arith.constant 0 : i32
    return %c0_i32, %c0_i32_0 : i32, i32
  }
  func.func @transform_4(%arg0: i32) -> (i32, i32) {
    %c0_i32 = arith.constant 0 : i32
    %c0_i32_0 = arith.constant 0 : i32
    %c0_i32_1 = arith.constant 0 : i32
    return %c0_i32, %c0_i32_0 : i32, i32
  }
  func.func @transform_5(%arg0: i32) -> (i32, i32) {
    %c0_i32 = arith.constant 0 : i32
    %c0_i32_0 = arith.constant 0 : i32
    %c0_i32_1 = arith.constant 0 : i32
    return %c0_i32, %c0_i32_0 : i32, i32
  }
  func.func @transform_6(%arg0: i32) -> (i32, i32) {
    %c0_i32 = arith.constant 0 : i32
    %c0_i32_0 = arith.constant 0 : i32
    %c0_i32_1 = arith.constant 0 : i32
    return %c0_i32, %c0_i32_0 : i32, i32
  }
  func.func @transform_7(%arg0: i32) -> (i32, i32) {
    %c0_i32 = arith.constant 0 : i32
    %c0_i32_0 = arith.constant 0 : i32
    %c0_i32_1 = arith.constant 0 : i32
    return %c0_i32, %c0_i32_0 : i32, i32
  }
  func.func @transform_8(%arg0: i32) -> (i32, i32) {
    %c0_i32 = arith.constant 0 : i32
    %c0_i32_0 = arith.constant 0 : i32
    %c0_i32_1 = arith.constant 0 : i32
    return %c0_i32, %c0_i32_0 : i32, i32
  }
  func.func @transform_9(%arg0: i32) -> (i32, i32) {
    %c0_i32 = arith.constant 0 : i32
    %c0_i32_0 = arith.constant 0 : i32
    %c0_i32_1 = arith.constant 0 : i32
    return %c0_i32, %c0_i32_0 : i32, i32
  }
  func.func @transform_10(%arg0: i32) -> (i32, i32) {
    %c0_i32 = arith.constant 0 : i32
    %c0_i32_0 = arith.constant 0 : i32
    %c0_i32_1 = arith.constant 0 : i32
    return %c0_i32, %c0_i32_0 : i32, i32
  }
  func.func @transform_11(%arg0: i32) -> (i32, i32) {
    %c0_i32 = arith.constant 0 : i32
    %c0_i32_0 = arith.constant 0 : i32
    %c0_i32_1 = arith.constant 0 : i32
    return %c0_i32, %c0_i32_0 : i32, i32
  }
  func.func @transform_12(%arg0: i32) -> (i32, i32, i32) {
    %c0_i32 = arith.constant 0 : i32
    %c0_i32_0 = arith.constant 0 : i32
    %c0_i32_1 = arith.constant 0 : i32
    return %arg0, %c0_i32, %c0_i32_0 : i32, i32, i32
  }
}

</mosaic_0001>

<bundles_post_ra>
// kernel: far_near_surround_forward.1
= control target key start
LH: loop header
LB: loop body
LE: loop exit
PB: predicated region body
PF: predicated region fallthrough
CT: control target
= control target key end

     0   :  { %s1423_s21 = smov 0   ;;  %s1986_s0 = inlined_call_operand.vmem [shape: f32[2,36,256], index: 0, kind: input, shape index: {}]   ;;  %s1987_s1 = inlined_call_operand.vmem [shape: f32[2,72,256], index: 1, kind: input, shape index: {}]   ;;  %s1988_s2 = inlined_call_operand.vmem [shape: f32[9,256], index: 2, kind: input, shape index: {}]   ;;  %s1989_s3 = inlined_call_operand.vmem [shape: f32[8,36], index: 3, kind: input, shape index: {}]   ;;  %s1990_s4 = inlined_call_operand.vmem [shape: f32[8,1], index: 4, kind: input, shape index: {}]   ;;  %s1991_s5 = inlined_call_operand.vmem [shape: f32[8,72], index: 5, kind: input, shape index: {}]   ;;  %s1992_s6 = inlined_call_operand.vmem [shape: f32[8,1], index: 6, kind: input, shape index: {}]   ;;  %s1993_s7 = inlined_call_operand.vmem [shape: f32[8,72], index: 7, kind: input, shape index: {}]   ;;  %s1994_s8 = inlined_call_operand.vmem [shape: f32[8,1], index: 8, kind: input, shape index: {}]   ;;  %s1995_s9 = inlined_call_operand.vmem [shape: f32[256,10], index: 9, kind: input, shape index: {}]   ;;  %s1996_s10 = inlined_call_operand.vmem [shape: f32[8,10], index: 10, kind: input, shape index: {}]   ;;  %s1997_s11 = inlined_call_operand.vmem [shape: f32[1,10], index: 11, kind: input, shape index: {}]   ;;  %s1998_s12 = inlined_call_operand.vmem [shape: f32[2,3,10], index: 12, kind: output, shape index: {}]  }
   0x1 LB: > { %s1262_s22 = sadd.s32 4294967295, %s1347_s21   ;;  %p1266_p0 = scmp.ge.s32.totalorder %s1347_s21, 1  ;;  %s1347_s21 = sphi %s1423_s21, %s22_s21  }
   0x2   : > { %p372_p1 = scmp.lt.s32.totalorder %s1347_s21, 3 }
   0x4   : > { %p373_p2 = pnand %p1266_p0, %p372_p1 }
   0x5   : > { %p418_p3 = scmp.lt.s32.totalorder (!%p373_p2), %s1262_s22, 1  ;;  %s1350_s19 = smov (!%p373_p2), 111  }
   0x6   : > { %376 = sbr.rel (%p373_p2) target bundleno = 990 (0x3de), region = 68  ;;  %s1351_s20 = smov (!%p373_p2), 112  }
   0x7   : > { %s1352_s23 = smov (!%p373_p2), 113   ;;  %s1353_s24 = smov (!%p373_p2), 1  }
   0x8   : > { %s1354_s25 = smov (!%p373_p2), 127   ;;  %s1355_s26 = smov (!%p373_p2), 15  }
   0x9   : > { %s1356_s27 = smov (!%p373_p2), 17   ;;  %s1357_s28 = smov (!%p373_p2), 16  }
   0xb   : > { %v500_v0 = vld [vmem:[%s1990_s4] sm:$0xff]  ;;  %v1349_v1 = vmov 0   ;;  %v1437_v2 = vld [vmem:[%s1995_s9 + $0x78] sm:$0xff]  ;;  %v1447_v4 = vld [vmem:[%s1995_s9 + $0x70] sm:$0xff]  ;;  %s2020_s22 = smov (!%p418_p3, %s1262_s22), 1  ;;  %vm510_vm0 = vcmask 1043456  }
   0xc   : > { %1301 = vset.pattern.permute.xlu0 %v1349_v1  ;;  %v1442_v3 = vld [vmem:[%s1995_s9 + $0xf8] sm:$0xff]  ;;  %1302 = vset.pattern.permute.xlu2 %v1349_v1  ;;  %v1455_v5 = vld [vmem:[%s1995_s9 + $0xf0] sm:$0xff]  ;;  %s1282_s15 = smul.u32 80, %s2020_s22  ;;  %v499_v16 = vld [vmem:[%s1989_s3] sm:$0xff]  ;;  %vm506_vm1 = vcmask 293888   ;;  %vm592_vm2 = vcmask 588800  }
   0xd   : > { %503 = vperm.xlu0 %1301, %v500_v0   ;;  %644 = vmatpush.msra.mxu0 %v1437_v2  ;;  %v1470_v17 = vld [vmem:[%s1995_s9 + $0x68] sm:$0xff]  ;;  %v1482_v19 = vld [vmem:[%s1995_s9 + $0x60] sm:$0xff]  ;;  %v1494_v21 = vld [vmem:[%s1995_s9 + $0x58] sm:$0xff]  ;;  %s1283_s17 = smul.u32 144, %s2020_s22  ;;  %vm812_vm7 = vcmask 908288   ;;  %vm798_vm8 = vcmask 916480  }
   0xe   : > { %664 = vmatpush.msra.mxu1 %v1442_v3  ;;  %s422_s18 = scalar_lea.vmem %s1986_s0, %s1282_s15  ;;  %v1475_v18 = vld [vmem:[%s1995_s9 + $0xe8] sm:$0xff]  ;;  %v1487_v20 = vld [vmem:[%s1995_s9 + $0xe0] sm:$0xff]  ;;  %v1499_v22 = vld [vmem:[%s1995_s9 + $0xd8] sm:$0xff]  ;;  %vm784_vm9 = vcmask 924672   ;;  %vm770_vm10 = vcmask 1039360   ;;  %vm757_vm11 = vcmask 7168  }
   0xf   : > { %645 = vmatpush.msra.mxu0 %v1447_v4  ;;  %v440_v6 = vld [vmem:[%s422_s18 + $0x40] sm:$0xf]  ;;  %v441_v7 = vld [vmem:[%s422_s18 + $0x48] sm:$0xf]  ;;  %v438_v8 = vld [vmem:[%s422_s18 + $0x30] sm:$0xff]  ;;  %s1627_s30 = scalar_lea.vmem %s1987_s1, %s1283_s17  ;;  %vm743_vm12 = vcmask 121856  }
  0x10   : > { %665 = vmatpush.msra.mxu1 %v1455_v5  ;;  %1270 = vmatpush.msk.msra.mxu2 %vm510_vm0, %v440_v6  ;;  %v439_v9 = vld [vmem:[%s422_s18 + $0x38] sm:$0xff]  ;;  %v436_v10 = vld [vmem:[%s422_s18 + $0x20] sm:$0xff]  ;;  %v437_v11 = vld [vmem:[%s422_s18 + $0x28] sm:$0xff]  ;;  %vm729_vm13 = vcmask 130048   ;;  %vm715_vm14 = vcmask 138240  }
  0x11   : > { %1272 = vmatpush.msk.msra.mxu3 %vm510_vm0, %v441_v7  ;;  %v434_v12 = vld [vmem:[%s422_s18 + $0x10] sm:$0xff]  ;;  %v435_v13 = vld [vmem:[%s422_s18 + $0x18] sm:$0xff]  ;;  %v432_v14 = vld [vmem:[%s422_s18] sm:$0xff]  ;;  %646 = vmatpush.msra.mxu0 %v1470_v17 }
  0x12   : > { %529 = vmatpush.msra.mxu2 %v438_v8  ;;  %v433_v15 = vld [vmem:[%s422_s18 + $0x8] sm:$0xff]  ;;  %666 = vmatpush.msra.mxu1 %v1475_v18  ;;  %v1506_v23 = vld [vmem:[%s1995_s9 + $0x50] sm:$0xff]  ;;  %v1530_v27 = vld [vmem:[%s1995_s9 + $0x40] sm:$0xff] }
  0x13   : > { %549 = vmatpush.msra.mxu3 %v439_v9  ;;  %647 = vmatpush.msra.mxu0 %v1482_v19  ;;  %v1511_v24 = vld [vmem:[%s1995_s9 + $0xd0] sm:$0xff]  ;;  %v1518_v25 = vld [vmem:[%s1995_s9 + $0x48] sm:$0xff]  ;;  %v1535_v28 = vld [vmem:[%s1995_s9 + $0xc0] sm:$0xff] }
  0x14   : > { %530 = vmatpush.msra.mxu2 %v436_v10  ;;  %667 = vmatpush.msra.mxu1 %v1487_v20  ;;  %v1523_v26 = vld [vmem:[%s1995_s9 + $0xc8] sm:$0xff]  ;;  %v1542_v29 = vld [vmem:[%s1995_s9 + $0x38] sm:$0xff]  ;;  %v1554_v31 = vld [vmem:[%s1995_s9 + $0x30] sm:$0xff] }
  0x15   : > { %550 = vmatpush.msra.mxu3 %v437_v11  ;;  %648 = vmatpush.msra.mxu0 %v1494_v21  ;;  %v1547_v30 = vld [vmem:[%s1995_s9 + $0xb8] sm:$0xff]  ;;  %v1559_v32 = vld [vmem:[%s1995_s9 + $0xb0] sm:$0xff]  ;;  %v1566_v33 = vld [vmem:[%s1995_s9 + $0x28] sm:$0xff] }
  0x16   : > { %531 = vmatpush.msra.mxu2 %v434_v12  ;;  %668 = vmatpush.msra.mxu1 %v1499_v22  ;;  %v1571_v34 = vld [vmem:[%s1995_s9 + $0xa8] sm:$0xff]  ;;  %v1578_v35 = vld [vmem:[%s1995_s9 + $0x20] sm:$0xff]  ;;  %v1590_v37 = vld [vmem:[%s1995_s9 + $0x18] sm:$0xff] }
  0x17   : > { %551 = vmatpush.msra.mxu3 %v435_v13  ;;  %649 = vmatpush.msra.mxu0 %v1506_v23  ;;  %v1583_v36 = vld [vmem:[%s1995_s9 + $0xa0] sm:$0xff]  ;;  %v1595_v38 = vld [vmem:[%s1995_s9 + $0x98] sm:$0xff]  ;;  %v1603_v39 = vld [vmem:[%s1995_s9 + $0x10] sm:$0xff] }
  0x18   : > { %532 = vmatpush.msra.mxu2 %v432_v14  ;;  %669 = vmatpush.msra.mxu1 %v1511_v24  ;;  %v1608_v40 = vld [vmem:[%s1995_s9 + $0x90] sm:$0xff]  ;;  %v1615_v41 = vld [vmem:[%s1995_s9 + $0x8] sm:$0xff]  ;;  %v1632_v43 = vld [vmem:[%s1995_s9] sm:$0xff] }
  0x19   : > { %552 = vmatpush.msra.mxu3 %v433_v15  ;;  %1271 = vmatmul.msk.f32.vlgmr.msra.gmra.mxu2 %vm506_vm1, %v499_v16  ;;  %v1620_v42 = vld [vmem:[%s1995_s9 + $0x88] sm:$0xff]  ;;  %v1637_v44 = vld [vmem:[%s1995_s9 + $0x80] sm:$0xff]  ;;  %v456_v47 = vld [vmem:[%s1627_s30 + $0x70] sm:$0xff] }
  0x1a   : > { %1273 = vmatmul.msk.f32.vlgmr.msra.gmra.mxu3 %vm506_vm1, %v499_v16  ;;  %650 = vmatpush.msra.mxu0 %v1518_v25  ;;  %v458_v45 = vld [vmem:[%s1627_s30 + $0x80] sm:$0xff]  ;;  %v459_v46 = vld [vmem:[%s1627_s30 + $0x88] sm:$0xff]  ;;  %v457_v49 = vld [vmem:[%s1627_s30 + $0x78] sm:$0xff] }
  0x1b   : > { %670 = vmatpush.msra.mxu1 %v1523_v26  ;;  %603 = vmatpush.msrb.mxu2 %v458_v45  ;;  %v454_v50 = vld [vmem:[%s1627_s30 + $0x60] sm:$0xff]  ;;  %v455_v51 = vld [vmem:[%s1627_s30 + $0x68] sm:$0xff]  ;;  %v452_v58 = vld [vmem:[%s1627_s30 + $0x50] sm:$0xff] }
  0x1c   : > { %651 = vmatpush.msra.mxu0 %v1530_v27  ;;  %623 = vmatpush.msrb.mxu3 %v459_v46  ;;  %v453_v59 = vld [vmem:[%s1627_s30 + $0x58] sm:$0xff]  ;;  %v450_v60 = vld [vmem:[%s1627_s30 + $0x40] sm:$0xff]  ;;  %v451_v63 = vld [vmem:[%s1627_s30 + $0x48] sm:$0xff] }
  0x1d   : > { %671 = vmatpush.msra.mxu1 %v1535_v28  ;;  %604 = vmatpush.msrb.mxu2 %v456_v47  ;;  %v448_v0 = vld [vmem:[%s1627_s30 + $0x30] sm:$0xff]  ;;  %v449_v1 = vld [vmem:[%s1627_s30 + $0x38] sm:$0xff]  ;;  %v446_v6 = vld [vmem:[%s1627_s30 + $0x20] sm:$0xff] }
  0x1e   : > { %652 = vmatpush.msra.mxu0 %v1542_v29  ;;  %624 = vmatpush.msrb.mxu3 %v457_v49  ;;  %v447_v7 = vld [vmem:[%s1627_s30 + $0x28] sm:$0xff]  ;;  %v444_v8 = vld [vmem:[%s1627_s30 + $0x10] sm:$0xff]  ;;  %v445_v9 = vld [vmem:[%s1627_s30 + $0x18] sm:$0xff] }
  0x1f   : > { %672 = vmatpush.msra.mxu1 %v1547_v30  ;;  %605 = vmatpush.msrb.mxu2 %v454_v50  ;;  %v442_v10 = vld [vmem:[%s1627_s30] sm:$0xff]  ;;  %v443_v12 = vld [vmem:[%s1627_s30 + $0x8] sm:$0xff] }
  0x20   : > { %653 = vmatpush.msra.mxu0 %v1554_v31  ;;  %625 = vmatpush.msrb.mxu3 %v455_v51  ;;  %v585_v13 = vld [vmem:[%s1991_s5] sm:$0xff] }
  0x21   : > { %673 = vmatpush.msra.mxu1 %v1559_v32  ;;  %606 = vmatpush.msrb.mxu2 %v452_v58 }
  0x22   : > { %654 = vmatpush.msra.mxu0 %v1566_v33  ;;  %626 = vmatpush.msrb.mxu3 %v453_v59 }
  0x23   : > { %674 = vmatpush.msra.mxu1 %v1571_v34  ;;  %607 = vmatpush.msrb.mxu2 %v450_v60 }
  0x24   : > { %655 = vmatpush.msra.mxu0 %v1578_v35  ;;  %627 = vmatpush.msrb.mxu3 %v451_v63 }
  0x25   : > { %675 = vmatpush.msra.mxu1 %v1583_v36  ;;  %608 = vmatpush.msrb.mxu2 %v448_v0  ;;  %v1716_v0 = vld [vmem:[%s1988_s2 + $0x10] ss:$0 sm:$0xff] }
  0x26   : > { %656 = vmatpush.msra.mxu0 %v1590_v37  ;;  %628 = vmatpush.msrb.mxu3 %v449_v1  ;;  %v1721_v1 = vld [vmem:[%s1988_s2 + $0x18] ss:$0 sm:$0xff] }
  0x27   : > { %676 = vmatpush.msra.mxu1 %v1595_v38  ;;  %609 = vmatpush.msrb.mxu2 %v446_v6 }
  0x28   : > { %657 = vmatpush.msra.mxu0 %v1603_v39  ;;  %629 = vmatpush.msrb.mxu3 %v447_v7 }
  0x29   : > { %677 = vmatpush.msra.mxu1 %v1608_v40  ;;  %610 = vmatpush.msrb.mxu2 %v444_v8 }
  0x2a   : > { %658 = vmatpush.msra.mxu0 %v1615_v41  ;;  %630 = vmatpush.msrb.mxu3 %v445_v9 }
  0x2b   : > { %678 = vmatpush.msra.mxu1 %v1620_v42  ;;  %611 = vmatpush.msrb.mxu2 %v442_v10 }
  0x2c   : > { %659 = vmatpush.msra.mxu0 %v1632_v43  ;;  %631 = vmatpush.msrb.mxu3 %v443_v12 }
  0x2d   : > { %679 = vmatpush.msra.mxu1 %v1637_v44  ;;  %1274 = vmatmul.msk.f32.vlgmr.msrb.gmra.mxu2 %vm592_vm2, %v585_v13 }
  0x2e   : > { %1275 = vmatmul.msk.f32.vlgmr.msrb.gmra.mxu3 %vm592_vm2, %v585_v13  ;;  %v1730_v13 = vld [vmem:[%s1988_s2] sm:$0xff] }
  0x7f   : > { %v504_v48 = vpop.permute.xlu0 %503 }
  0x9c   : > { %v534_v52 = vpop.f32.mrf.mxu2 }
  0x9d   : > { %v554_v53 = vpop.f32.mrf.mxu3  ;;  %v535_v54 = vadd.f32 %v534_v52, %v504_v48 }
  0x9e   : > { %v1647_v55 = vadd.f32 %v554_v53, %v504_v48 }
  0x9f   : > { %v559_v56 = vmin.f32 %v535_v54, 20.0  ;;  %vm557_vm4 = vcmp.gt.f32.partialorder %v535_v54, 20.0 }
  0xa0   : > { %v560_v57 = vmin.f32 %v1647_v55, 20.0  ;;  %vm558_vm6 = vcmp.gt.f32.partialorder %v1647_v55, 20.0 }
  0xa1   : > { %v561_v61 = vmul.f32 1.442695, %v559_v56 }
  0xa2   : > { %v563_v62 = vmul.f32 1.442695, %v560_v57 }
  0xa3   : > { %1305 = vpow2.f32 %v561_v61 }
  0xa4   : > { %1307 = vpow2.f32 %v563_v62 }
  0xa9   : > { %v1306_v11 = vpop.eup %1305 }
  0xaa   : > { %v1308_v14 = vpop.eup %1307  ;;  %v565_v15 = vadd.f32 1.0, %v1306_v11  ;;  %v568_v16 = vmul.f32 -0.5, %v1306_v11  ;;  %v571_v48 = vand.u32 2147483647, %v1306_v11 }
  0xab   : > { %v574_v45 = vadd.f32 1.0, %v1308_v14  ;;  %v577_v46 = vmul.f32 -0.5, %v1308_v14  ;;  %v580_v50 = vand.u32 2147483647, %v1308_v14 }
  0xac   : > { %1309 = vlog2.f32 %v565_v15  ;;  %v569_v47 = vadd.f32 1.0, %v568_v16  ;;  %vm572_vm3 = vcmp.lt.f32.partialorder %v571_v48, 0.0004427343  ;;  %v804_v15 = vperm.slane %v1730_v13, 7 }
  0xad   : > { %1311 = vlog2.f32 %v574_v45  ;;  %v578_v49 = vadd.f32 1.0, %v577_v46  ;;  %vm581_vm5 = vcmp.lt.f32.partialorder %v580_v50, 0.0004427343 }
  0xae   : > { %v570_v56 = vmul.f32 %v1306_v11, %v569_v47  ;;  %v790_v47 = vperm.slane %v1730_v13, 6 }
  0xaf   : > { %v579_v58 = vmul.f32 %v1308_v14, %v578_v49  ;;  %v1735_v14 = vld [vmem:[%s1988_s2 + $0x8] sm:$0xff] }
  0xb0   : > { %v805_v16 = vperm.slane %v1735_v14, 7  ;;  %v791_v48 = vperm.slane %v1735_v14, 6 }
  0xb2   : > { %v1310_v51 = vpop.eup %1309 }
  0xb3   : > { %v1312_v52 = vpop.eup %1311  ;;  %v567_v53 = vmul.f32 0.6931472, %v1310_v51 }
  0xb4   : > { %v576_v57 = vmul.f32 0.6931472, %v1312_v52 }
  0xb5   : > { %v573_v59 = vsel %vm572_vm3, %v570_v56, %v567_v53 }
  0xb6   : > { %v1667_v60 = vsel %vm557_vm4, %v535_v54, %v573_v59  ;;  %v582_v61 = vsel %vm581_vm5, %v579_v58, %v576_v57  ;;  %v636_v54 = vld [vmem:[%s1994_s8] sm:$0xff] }
  0xb7   : > { %v1671_v62 = vsel %vm558_vm6, %v1647_v55, %v582_v61  ;;  %808 = vrot.lane.b32.xlu0 %v1667_v60, %s1350_s19  ;;  %660 = vmatmul.f32.vlgmr.msra.gmra.mxu0 %v1667_v60  ;;  %v586_v55 = vld [vmem:[%s1992_s6] sm:$0xff]  ;;  %v2008_v61 = vperm.slane %v1730_v13, 5 }
  0xb8   : > { %796 = vrot.lane.b32.xlu2 %v1671_v62, %s1351_s20  ;;  %810 = vrot.lane.b32.xlu1 %v1671_v62, %s1350_s19 }
  0xb9   : > { %680 = vmatmul.f32.vlgmr.msra.gmra.mxu1 %v1671_v62 }
  0xbf   : > { %782 = vrot.lane.b32.xlu0 %v1671_v62, %s1352_s23 }
  0xc0   : > { %780 = vrot.lane.b32.xlu2 %v1667_v60, %s1352_s23  ;;  %794 = vrot.lane.b32.xlu1 %v1667_v60, %s1351_s20 }
  0xc7   : > { %752 = vrot.lane.b32.xlu0 %v1671_v62, %s1353_s24 }
  0xc8   : > { %768 = vrot.lane.b32.xlu2 %v1671_v62, %s1354_s25  ;;  %766 = vrot.lane.b32.xlu1 %v1667_v60, %s1354_s25 }
  0xcf   : > { %741 = vrot.lane.b32.xlu0 %v1667_v60, %s1355_s26 }
  0xd0   : > { %738 = vrot.lane.b32.xlu2 %v1671_v62, %s1355_s26  ;;  %755 = vrot.lane.b32.xlu1 %v1667_v60, %s1353_s24 }
  0xd7   : > { %709 = vrot.lane.b32.xlu0 %v1671_v62, %s1356_s27 }
  0xd8   : > { %727 = vrot.lane.b32.xlu2 %v1667_v60, %s1357_s28  ;;  %724 = vrot.lane.b32.xlu1 %v1671_v62, %s1357_s28 }
  0xdf   : > { %639 = vperm.xlu0 %1301, %v636_v54   ;;  %v2007_v54 = vperm.slane %v1735_v14, 5 }
  0xe0   : > { %713 = vrot.lane.b32.xlu1 %v1667_v60, %s1356_s27  ;;  %589 = vperm.xlu2 %1302, %v586_v55  }
 0x112   : > { %v797_v63 = vpop.permute.xlu2 %796 }
 0x11a   : > { %v781_v10 = vpop.permute.xlu2 %780 }
 0x122   : > { %v769_v57 = vpop.permute.xlu2 %768 }
 0x129   : > { %v809_v6 = vpop.permute.xlu0 %808 }
 0x12a   : > { %v811_v7 = vpop.permute.xlu1 %810 }
 0x12b   : > { %v813_v8 = vsel %vm812_vm7, %v809_v6, %v811_v7  ;;  %v817_v9 = vsel %vm812_vm7, %v811_v7, %v809_v6 }
 0x12c   : > { %v820_v11 = vmul.f32 %v1716_v0, %v813_v8  ;;  %v821_v12 = vmul.f32 %v1721_v1, %v817_v9 }
 0x12e   : > { %832 = vmatpush.msra.mxu2 %v820_v11  ;;  %852 = vmatpush.msra.mxu3 %v821_v12  ;;  %v2005_v11 = vperm.slane %v1730_v13, 3  ;;  %v2006_v12 = vperm.slane %v1735_v14, 3 }
 0x131   : > { %v783_v45 = vpop.permute.xlu0 %782 }
 0x132   : > { %v795_v46 = vpop.permute.xlu1 %794  ;;  %v785_v51 = vsel %vm784_vm9, %v781_v10, %v783_v45  ;;  %v789_v52 = vsel %vm784_vm9, %v783_v45, %v781_v10  ;;  %v739_v10 = vpop.permute.xlu2 %738 }
 0x133   : > { %v799_v49 = vsel %vm798_vm8, %v795_v46, %v797_v63  ;;  %v803_v50 = vsel %vm798_vm8, %v797_v63, %v795_v46  ;;  %v792_v58 = vmul.f32 %v790_v47, %v785_v51  ;;  %v793_v59 = vmul.f32 %v791_v48, %v789_v52 }
 0x134   : > { %v806_v53 = vmul.f32 %v804_v15, %v799_v49  ;;  %v807_v56 = vmul.f32 %v805_v16, %v803_v50  ;;  %v2003_v49 = vperm.slane %v1730_v13, 2  ;;  %v2004_v50 = vperm.slane %v1735_v14, 2 }
 0x136   : > { %833 = vmatpush.msra.mxu2 %v806_v53  ;;  %853 = vmatpush.msra.mxu3 %v807_v56 }
 0x138   : > { %834 = vmatpush.msra.mxu2 %v792_v58  ;;  %854 = vmatpush.msra.mxu3 %v793_v59 }
 0x139   : > { %v753_v55 = vpop.permute.xlu0 %752 }
 0x13a   : > { %v767_v63 = vpop.permute.xlu1 %766 }
 0x13b   : > { %v771_v6 = vsel %vm770_vm10, %v767_v63, %v769_v57  ;;  %v775_v7 = vsel %vm770_vm10, %v769_v57, %v767_v63 }
 0x13c   : > { %v778_v8 = vmul.f32 %v2008_v61, %v771_v6  ;;  %v779_v9 = vmul.f32 %v2007_v54, %v775_v7  ;;  %v2001_v6 = vperm.slane %v1735_v14, 1  ;;  %v728_v7 = vpop.permute.xlu2 %727 }
 0x13e   : > { %835 = vmatpush.msra.mxu2 %v778_v8  ;;  %855 = vmatpush.msra.mxu3 %v779_v9 }
 0x140   : > { %836 = vmatpush.msra.mxu2 %v1667_v60  ;;  %856 = vmatpush.msra.mxu3 %v1671_v62 }
 0x141   : > { %v742_v45 = vpop.permute.xlu0 %741 }
 0x142   : > { %v756_v46 = vpop.permute.xlu1 %755  ;;  %v744_v53 = vsel %vm743_vm12, %v742_v45, %v739_v10  ;;  %v747_v56 = vsel %vm743_vm12, %v739_v10, %v742_v45 }
 0x143   : > { %v758_v51 = vsel %vm757_vm11, %v756_v46, %v753_v55  ;;  %v761_v52 = vsel %vm757_vm11, %v753_v55, %v756_v46  ;;  %v750_v59 = vmul.f32 %v2003_v49, %v747_v56  ;;  %v751_v63 = vmul.f32 %v2004_v50, %v744_v53 }
 0x144   : > { %v764_v57 = vmul.f32 %v2005_v11, %v761_v52  ;;  %v765_v58 = vmul.f32 %v2006_v12, %v758_v51  ;;  %v2002_v55 = vperm.slane %v1730_v13, 1  ;;  %v2000_v51 = vperm.slane %v1730_v13, 0 }
 0x145   : > { %v1999_v52 = vperm.slane %v1735_v14, 0 }
 0x146   : > { %837 = vmatpush.msra.mxu2 %v764_v57  ;;  %857 = vmatpush.msra.mxu3 %v765_v58 }
 0x148   : > { %838 = vmatpush.msra.mxu2 %v750_v59  ;;  %858 = vmatpush.msra.mxu3 %v751_v63 }
 0x149   : > { %v710_v53 = vpop.permute.xlu0 %709 }
 0x14a   : > { %v725_v8 = vpop.permute.xlu1 %724 }
 0x14b   : > { %v730_v9 = vsel %vm729_vm13, %v728_v7, %v725_v8  ;;  %v733_v10 = vsel %vm729_vm13, %v725_v8, %v728_v7  ;;  %v1798_v7 = vld [vmem:[%s1993_s7] sm:$0xff]  ;;  %v613_v8 = vpop.f32.mrf.mxu2 }
 0x14c   : > { %v736_v45 = vmul.f32 %v2002_v55, %v733_v10  ;;  %v737_v46 = vmul.f32 %v2001_v6, %v730_v9  ;;  %v633_v9 = vpop.f32.mrf.mxu3  ;;  %v590_v10 = vpop.permute.xlu2 %589 }
 0x14e   : > { %839 = vmatpush.msra.mxu2 %v736_v45  ;;  %859 = vmatpush.msra.mxu3 %v737_v46  ;;  %v614_v45 = vadd.f32 %v613_v8, %v590_v10  ;;  %v634_v46 = vadd.f32 %v633_v9, %v590_v10 }
 0x152   : > { %v714_v56 = vpop.permute.xlu1 %713 }
 0x153   : > { %v716_v57 = vsel %vm715_vm14, %v714_v56, %v710_v53  ;;  %v719_v58 = vsel %vm715_vm14, %v710_v53, %v714_v56  ;;  %v640_v53 = vpop.permute.xlu0 %639 }
 0x154   : > { %v722_v59 = vmul.f32 %v2000_v51, %v719_v58  ;;  %v723_v63 = vmul.f32 %v1999_v52, %v716_v57  ;;  %v1836_v58 = vadd.f32 %v640_v53, %v614_v45 }
 0x156   : > { %840 = vmatpush.msra.mxu2 %v722_v59  ;;  %860 = vmatpush.msra.mxu3 %v723_v63  ;;  %v1838_v59 = vadd.f32 %v640_v53, %v634_v46 }
 0x157   : > { %1276 = vmatmul.msk.f32.vlgmr.msra.gmra.mxu2 %vm592_vm2, %v1798_v7  ;;  %1277 = vmatmul.msk.f32.vlgmr.msra.gmra.mxu3 %vm592_vm2, %v1798_v7 }
 0x158   : > { %897 = vmatpush.msrb.mxu2 %v1437_v2  ;;  %917 = vmatpush.msrb.mxu3 %v1442_v3 }
 0x15a   : > { %898 = vmatpush.msrb.mxu2 %v1447_v4  ;;  %918 = vmatpush.msrb.mxu3 %v1455_v5 }
 0x15c   : > { %899 = vmatpush.msrb.mxu2 %v1470_v17  ;;  %919 = vmatpush.msrb.mxu3 %v1475_v18 }
 0x15e   : > { %900 = vmatpush.msrb.mxu2 %v1482_v19  ;;  %920 = vmatpush.msrb.mxu3 %v1487_v20 }
 0x160   : > { %901 = vmatpush.msrb.mxu2 %v1494_v21  ;;  %921 = vmatpush.msrb.mxu3 %v1499_v22 }
 0x162   : > { %902 = vmatpush.msrb.mxu2 %v1506_v23  ;;  %922 = vmatpush.msrb.mxu3 %v1511_v24 }
 0x164   : > { %903 = vmatpush.msrb.mxu2 %v1518_v25  ;;  %923 = vmatpush.msrb.mxu3 %v1523_v26 }
 0x166   : > { %904 = vmatpush.msrb.mxu2 %v1530_v27  ;;  %924 = vmatpush.msrb.mxu3 %v1535_v28 }
 0x168   : > { %905 = vmatpush.msrb.mxu2 %v1542_v29  ;;  %925 = vmatpush.msrb.mxu3 %v1547_v30 }
 0x16a   : > { %906 = vmatpush.msrb.mxu2 %v1554_v31  ;;  %926 = vmatpush.msrb.mxu3 %v1559_v32 }
 0x16c   : > { %907 = vmatpush.msrb.mxu2 %v1566_v33  ;;  %927 = vmatpush.msrb.mxu3 %v1571_v34 }
 0x16e   : > { %908 = vmatpush.msrb.mxu2 %v1578_v35  ;;  %928 = vmatpush.msrb.mxu3 %v1583_v36 }
 0x170   : > { %909 = vmatpush.msrb.mxu2 %v1590_v37  ;;  %929 = vmatpush.msrb.mxu3 %v1595_v38 }
 0x172   : > { %910 = vmatpush.msrb.mxu2 %v1603_v39  ;;  %930 = vmatpush.msrb.mxu3 %v1608_v40 }
 0x174   : > { %911 = vmatpush.msrb.mxu2 %v1615_v41  ;;  %931 = vmatpush.msrb.mxu3 %v1620_v42 }
 0x176   : > { %912 = vmatpush.msrb.mxu2 %v1632_v43  ;;  %932 = vmatpush.msrb.mxu3 %v1637_v44 }
 0x1da   : > { %v842_v56 = vpop.f32.mrf.mxu2  ;;  %v862_v57 = vpop.f32.mrf.mxu3 }
 0x1db   : > { %v865_v63 = vadd.f32 %v842_v56, %v1667_v60  ;;  %v866_v52 = vadd.f32 %v862_v57, %v1671_v62 }
 0x1dd   : > { %v867_v51 = vadd.f32 %v865_v63, %v1836_v58  ;;  %v868_v6 = vadd.f32 %v866_v52, %v1838_v59 }
 0x1df   : > { %v871_v55 = vmin.f32 %v867_v51, 20.0  ;;  %v872_v49 = vmin.f32 %v868_v6, 20.0  ;;  %vm869_vm0 = vcmp.gt.f32.partialorder %v867_v51, 20.0  ;;  %vm870_vm3 = vcmp.gt.f32.partialorder %v868_v6, 20.0 }
 0x1e1   : > { %v873_v50 = vmul.f32 1.442695, %v871_v55  ;;  %v875_v8 = vmul.f32 1.442695, %v872_v49 }
 0x1e3   : > { %1313 = vpow2.f32 %v873_v50 }
 0x1e4   : > { %1315 = vpow2.f32 %v875_v8 }
 0x1e9   : > { %v1314_v9 = vpop.eup %1313 }
 0x1ea   : > { %v1316_v10 = vpop.eup %1315  ;;  %v877_v45 = vadd.f32 1.0, %v1314_v9  ;;  %v880_v11 = vmul.f32 -0.5, %v1314_v9  ;;  %v883_v62 = vand.u32 2147483647, %v1314_v9 }
 0x1eb   : > { %v886_v46 = vadd.f32 1.0, %v1316_v10  ;;  %v889_v53 = vmul.f32 -0.5, %v1316_v10  ;;  %v892_v57 = vand.u32 2147483647, %v1316_v10 }
 0x1ec   : > { %1317 = vlog2.f32 %v877_v45  ;;  %v881_v60 = vadd.f32 1.0, %v880_v11  ;;  %vm884_vm15 = vcmp.lt.f32.partialorder %v883_v62, 0.0004427343 }
 0x1ed   : > { %1319 = vlog2.f32 %v886_v46  ;;  %v890_v56 = vadd.f32 1.0, %v889_v53  ;;  %vm893_vm1 = vcmp.lt.f32.partialorder %v892_v57, 0.0004427343 }
 0x1ee   : > { %v882_v54 = vmul.f32 %v1314_v9, %v881_v60 }
 0x1ef   : > { %v891_v50 = vmul.f32 %v1316_v10, %v890_v56 }
 0x1f2   : > { %v1318_v63 = vpop.eup %1317 }
 0x1f3   : > { %v1320_v52 = vpop.eup %1319  ;;  %v879_v12 = vmul.f32 0.6931472, %v1318_v63 }
 0x1f4   : > { %v888_v49 = vmul.f32 0.6931472, %v1320_v52 }
 0x1f5   : > { %v885_v55 = vsel %vm884_vm15, %v882_v54, %v879_v12  ;;  %vm1193_vm15 = vcmask 1041408  }
 0x1f6   : > { %v1844_v8 = vsel %vm869_vm0, %v867_v51, %v885_v55  ;;  %v894_v45 = vsel %vm893_vm1, %v891_v50, %v888_v49  ;;  %vm1195_vm0 = vcmask 75776  }
 0x1f7   : > { %v1846_v61 = vsel %vm870_vm3, %v868_v6, %v894_v45  ;;  %1028 = vrot.lane.b32.xlu0 %v1844_v8, %s1351_s20  ;;  %1039 = vrot.lane.b32.xlu1 %v1844_v8, %s1350_s19 }
 0x1f8   : > { %1041 = vrot.lane.b32.xlu2 %v1846_v61, %s1350_s19  ;;  %933 = vmatmul.f32.vlgmr.msrb.gmra.mxu3 %v1846_v61 }
 0x1f9   : > { %913 = vmatmul.f32.vlgmr.msrb.gmra.mxu2 %v1844_v8 }
 0x1ff   : > { %1019 = vrot.lane.b32.xlu0 %v1846_v61, %s1352_s23  ;;  %1030 = vrot.lane.b32.xlu1 %v1846_v61, %s1351_s20 }
 0x200   : > { %1017 = vrot.lane.b32.xlu2 %v1844_v8, %s1352_s23 }
 0x207   : > { %995 = vrot.lane.b32.xlu0 %v1846_v61, %s1353_s24  ;;  %1006 = vrot.lane.b32.xlu1 %v1844_v8, %s1354_s25 }
 0x208   : > { %1008 = vrot.lane.b32.xlu2 %v1846_v61, %s1354_s25  ;;  %s1269_s25 = sshll.u32 %s2020_s22, 2 }
 0x20f   : > { %987 = vrot.lane.b32.xlu0 %v1844_v8, %s1355_s26  ;;  %998 = vrot.lane.b32.xlu1 %v1844_v8, %s1353_s24 }
 0x210   : > { %984 = vrot.lane.b32.xlu2 %v1846_v61, %s1355_s26 }
 0x217   : > { %961 = vrot.lane.b32.xlu0 %v1846_v61, %s1356_s27  ;;  %973 = vrot.lane.b32.xlu1 %v1846_v61, %s1357_s28 }
 0x218   : > { %976 = vrot.lane.b32.xlu2 %v1844_v8, %s1357_s28  ;;  %s431_s28 = scalar_lea.vmem %s1998_s12, %s1269_s25 }
 0x21f   : > { %965 = vrot.lane.b32.xlu1 %v1844_v8, %s1356_s27 }
 0x252   : > { %v1042_v54 = vpop.permute.xlu2 %1041 }
 0x25a   : > { %v1018_v9 = vpop.permute.xlu2 %1017 }
 0x262   : > { %v1009_v49 = vpop.permute.xlu2 %1008 }
 0x269   : > { %v1029_v11 = vpop.permute.xlu0 %1028  ;;  %v1040_v12 = vpop.permute.xlu1 %1039 }
 0x26a   : > { %v1043_v6 = vsel %vm812_vm7, %v1040_v12, %v1042_v54  ;;  %v1047_v51 = vsel %vm812_vm7, %v1042_v54, %v1040_v12  ;;  %v2010_v12 = vperm.slane %v1735_v14, 5  ;;  %vm685_vm7 = vcmask 80896  }
 0x26b   : > { %v1048_v10 = vmul.f32 %v1716_v0, %v1043_v6  ;;  %v1049_v46 = vmul.f32 %v1721_v1, %v1047_v51 }
 0x26d   : > { %1057 = vmatpush.msrb.mxu0 %v1048_v10  ;;  %1077 = vmatpush.msrb.mxu1 %v1049_v46 }
 0x271   : > { %v1020_v53 = vpop.permute.xlu0 %1019  ;;  %v1031_v60 = vpop.permute.xlu1 %1030 }
 0x272   : > { %v1021_v62 = vsel %vm784_vm9, %v1018_v9, %v1020_v53  ;;  %v1025_v56 = vsel %vm784_vm9, %v1020_v53, %v1018_v9  ;;  %v1032_v57 = vsel %vm798_vm8, %v1029_v11, %v1031_v60  ;;  %v1036_v63 = vsel %vm798_vm8, %v1031_v60, %v1029_v11 }
 0x273   : > { %v1037_v52 = vmul.f32 %v1032_v57, %v804_v15  ;;  %v1038_v0 = vmul.f32 %v1036_v63, %v805_v16  ;;  %v1026_v1 = vmul.f32 %v1021_v62, %v790_v47  ;;  %v1027_v50 = vmul.f32 %v1025_v56, %v791_v48  ;;  %v985_v47 = vpop.permute.xlu2 %984 }
 0x274   : > { %v2009_v11 = vperm.slane %v1730_v13, 5  ;;  %v2011_v60 = vperm.slane %v1735_v14, 3  ;;  %v2012_v56 = vperm.slane %v1730_v13, 3  ;;  %v2013_v63 = vperm.slane %v1735_v14, 2 }
 0x275   : > { %1058 = vmatpush.msrb.mxu0 %v1037_v52  ;;  %1078 = vmatpush.msrb.mxu1 %v1038_v0  ;;  %v2014_v0 = vperm.slane %v1730_v13, 2 }
 0x277   : > { %1059 = vmatpush.msrb.mxu0 %v1026_v1  ;;  %1079 = vmatpush.msrb.mxu1 %v1027_v50 }
 0x279   : > { %v996_v55 = vpop.permute.xlu0 %995  ;;  %v1007_v45 = vpop.permute.xlu1 %1006 }
 0x27a   : > { %v1010_v54 = vsel %vm770_vm10, %v1007_v45, %v1009_v49  ;;  %v1014_v15 = vsel %vm770_vm10, %v1009_v49, %v1007_v45 }
 0x27b   : > { %v1015_v16 = vmul.f32 %v1010_v54, %v2009_v11  ;;  %v1016_v6 = vmul.f32 %v1014_v15, %v2010_v12  ;;  %v977_v1 = vpop.permute.xlu2 %976  ;;  %v2015_v54 = vperm.slane %v1730_v13, 1  ;;  %v2016_v11 = vperm.slane %v1735_v14, 1 }
 0x27d   : > { %1060 = vmatpush.msrb.mxu0 %v1015_v16  ;;  %1080 = vmatpush.msrb.mxu1 %v1016_v6 }
 0x27f   : > { %1061 = vmatpush.msrb.mxu0 %v1844_v8  ;;  %1081 = vmatpush.msrb.mxu1 %v1846_v61 }
 0x281   : > { %v988_v48 = vpop.permute.xlu0 %987  ;;  %v999_v51 = vpop.permute.xlu1 %998 }
 0x282   : > { %v989_v9 = vsel %vm743_vm12, %v988_v48, %v985_v47  ;;  %v1000_v10 = vsel %vm757_vm11, %v999_v51, %v996_v55  ;;  %v992_v46 = vsel %vm743_vm12, %v985_v47, %v988_v48  ;;  %v1003_v53 = vsel %vm757_vm11, %v996_v55, %v999_v51 }
 0x283   : > { %v1005_v62 = vmul.f32 %v1000_v10, %v2011_v60  ;;  %v1004_v57 = vmul.f32 %v1003_v53, %v2012_v56  ;;  %v994_v52 = vmul.f32 %v989_v9, %v2013_v63  ;;  %v993_v49 = vmul.f32 %v992_v46, %v2014_v0 }
 0x284   : > { %v2017_v51 = vperm.slane %v1730_v13, 0  ;;  %v2018_v10 = vperm.slane %v1735_v14, 0  ;;  %v914_v13 = vpop.f32.mrf.mxu2  ;;  %v934_v14 = vpop.f32.mrf.mxu3  ;;  %vm1191_vm12 = vcmask 1040384  }
 0x285   : > { %1082 = vmatpush.msrb.mxu1 %v1005_v62  ;;  %1062 = vmatpush.msrb.mxu0 %v1004_v57 }
 0x287   : > { %1083 = vmatpush.msrb.mxu1 %v994_v52  ;;  %1063 = vmatpush.msrb.mxu0 %v993_v49 }
 0x289   : > { %v974_v50 = vpop.permute.xlu1 %973  ;;  %v962_v12 = vpop.permute.xlu0 %961 }
 0x28a   : > { %v978_v55 = vsel %vm729_vm13, %v977_v1, %v974_v50  ;;  %v981_v45 = vsel %vm729_vm13, %v974_v50, %v977_v1 }
 0x28b   : > { %v982_v15 = vmul.f32 %v981_v45, %v2015_v54  ;;  %v983_v16 = vmul.f32 %v978_v55, %v2016_v11  ;;  %v497_v54 = vld [vmem:[%s1997_s11] sm:$0x1] }
 0x28d   : > { %1064 = vmatpush.msrb.mxu0 %v982_v15  ;;  %1084 = vmatpush.msrb.mxu1 %v983_v16 }
 0x291   : > { %v966_v6 = vpop.permute.xlu1 %965 }
 0x292   : > { %v967_v47 = vsel %vm715_vm14, %v966_v6, %v962_v12  ;;  %v970_v48 = vsel %vm715_vm14, %v962_v12, %v966_v6 }
 0x293   : > { %v971_v9 = vmul.f32 %v970_v48, %v2017_v51  ;;  %v972_v46 = vmul.f32 %v967_v47, %v2018_v10 }
 0x295   : > { %1065 = vmatpush.msrb.mxu0 %v971_v9  ;;  %1085 = vmatpush.msrb.mxu1 %v972_v46 }
 0x296   : > { %1278 = vmatmul.msk.f32.vlgmr.msrb.gmra.mxu0 %vm592_vm2, %v1798_v7  ;;  %1279 = vmatmul.msk.f32.vlgmr.msrb.gmra.mxu1 %vm592_vm2, %v1798_v7  ;;  %v496_v7 = vld [vmem:[%s1996_s10] sm:$0xff] }
 0x297   : > { %1122 = vmatpush.msra.mxu0 %v1437_v2  ;;  %1142 = vmatpush.msra.mxu1 %v1442_v3  ;;  %v661_v2 = vpop.f32.mrf.mxu0  ;;  %v681_v3 = vpop.f32.mrf.mxu1 }
 0x299   : > { %1123 = vmatpush.msra.mxu0 %v1447_v4  ;;  %1143 = vmatpush.msra.mxu1 %v1455_v5 }
 0x29b   : > { %1124 = vmatpush.msra.mxu0 %v1470_v17  ;;  %1144 = vmatpush.msra.mxu1 %v1475_v18 }
 0x29d   : > { %1125 = vmatpush.msra.mxu0 %v1482_v19  ;;  %1145 = vmatpush.msra.mxu1 %v1487_v20 }
 0x29f   : > { %1126 = vmatpush.msra.mxu0 %v1494_v21  ;;  %1146 = vmatpush.msra.mxu1 %v1499_v22 }
 0x2a1   : > { %1127 = vmatpush.msra.mxu0 %v1506_v23  ;;  %1147 = vmatpush.msra.mxu1 %v1511_v24 }
 0x2a3   : > { %1128 = vmatpush.msra.mxu0 %v1518_v25  ;;  %1148 = vmatpush.msra.mxu1 %v1523_v26 }
 0x2a5   : > { %1129 = vmatpush.msra.mxu0 %v1530_v27  ;;  %1149 = vmatpush.msra.mxu1 %v1535_v28 }
 0x2a7   : > { %1130 = vmatpush.msra.mxu0 %v1542_v29  ;;  %1150 = vmatpush.msra.mxu1 %v1547_v30 }
 0x2a9   : > { %1131 = vmatpush.msra.mxu0 %v1554_v31  ;;  %1151 = vmatpush.msra.mxu1 %v1559_v32 }
 0x2ab   : > { %1132 = vmatpush.msra.mxu0 %v1566_v33  ;;  %1152 = vmatpush.msra.mxu1 %v1571_v34 }
 0x2ad   : > { %1133 = vmatpush.msra.mxu0 %v1578_v35  ;;  %1153 = vmatpush.msra.mxu1 %v1583_v36 }
 0x2af   : > { %1134 = vmatpush.msra.mxu0 %v1590_v37  ;;  %1154 = vmatpush.msra.mxu1 %v1595_v38 }
 0x2b1   : > { %1135 = vmatpush.msra.mxu0 %v1603_v39  ;;  %1155 = vmatpush.msra.mxu1 %v1608_v40 }
 0x2b3   : > { %1136 = vmatpush.msra.mxu0 %v1615_v41  ;;  %1156 = vmatpush.msra.mxu1 %v1620_v42 }
 0x2b5   : > { %1137 = vmatpush.msra.mxu0 %v1632_v43  ;;  %1157 = vmatpush.msra.mxu1 %v1637_v44 }
 0x313   : > { %v1067_v4 = vpop.f32.mrf.mxu0  ;;  %v1087_v5 = vpop.f32.mrf.mxu1 }
 0x314   : > { %v1090_v17 = vadd.f32 %v1067_v4, %v1844_v8  ;;  %v1091_v18 = vadd.f32 %v1087_v5, %v1846_v61  ;;  %v935_v61 = vadd.f32 %v934_v14, %v914_v13 }
 0x316   : > { %v1092_v19 = vadd.f32 %v1090_v17, %v1836_v58  ;;  %v1093_v20 = vadd.f32 %v1091_v18, %v1838_v59  ;;  %v937_v58 = vmul.f32 %v935_v61, %v496_v7  ;;  %v682_v59 = vadd.f32 %v681_v3, %v661_v2 }
 0x318   : > { %v1096_v21 = vmin.f32 %v1092_v19, 20.0  ;;  %v1097_v22 = vmin.f32 %v1093_v20, 20.0  ;;  %vm1094_vm4 = vcmp.gt.f32.partialorder %v1092_v19, 20.0  ;;  %vm1095_vm6 = vcmp.gt.f32.partialorder %v1093_v20, 20.0 }
 0x319   : > { %v938_v8 = vsel %vm685_vm7, %v937_v58, 0.0  ;;  %v684_v53 = vmul.f32 %v682_v59, %v496_v7 }
 0x31a   : > { %v1098_v23 = vmul.f32 1.442695, %v1096_v21  ;;  %v1100_v24 = vmul.f32 1.442695, %v1097_v22  ;;  %v939_v60 = vrot.slane %v938_v8, 4 }
 0x31b   : > { %v686_v62 = vsel %vm685_vm7, %v684_v53, 0.0 }
 0x31c   : > { %1321 = vpow2.f32 %v1098_v23  ;;  %v940_v56 = vadd.f32 %v939_v60, %v938_v8  ;;  %v687_v57 = vrot.slane %v686_v62, 4 }
 0x31d   : > { %1323 = vpow2.f32 %v1100_v24 }
 0x31e   : > { %v941_v63 = vrot.slane %v940_v56, 2  ;;  %v688_v52 = vadd.f32 %v687_v57, %v686_v62 }
 0x320   : > { %v942_v0 = vadd.f32 %v941_v63, %v940_v56  ;;  %v689_v49 = vrot.slane %v688_v52, 2 }
 0x322   : > { %v1322_v25 = vpop.eup %1321  ;;  %v943_v1 = vrot.slane %v942_v0, 1  ;;  %v690_v50 = vadd.f32 %v689_v49, %v688_v52 }
 0x323   : > { %v1324_v26 = vpop.eup %1323  ;;  %v1102_v27 = vadd.f32 1.0, %v1322_v25  ;;  %v1105_v28 = vmul.f32 -0.5, %v1322_v25  ;;  %v1108_v32 = vand.u32 2147483647, %v1322_v25 }
 0x324   : > { %v1111_v29 = vadd.f32 1.0, %v1324_v26  ;;  %v1114_v30 = vmul.f32 -0.5, %v1324_v26  ;;  %v1117_v34 = vand.u32 2147483647, %v1324_v26  ;;  %v944_v55 = vadd.f32 %v943_v1, %v942_v0 }
 0x325   : > { %1325 = vlog2.f32 %v1102_v27  ;;  %v1106_v31 = vadd.f32 1.0, %v1105_v28  ;;  %vm1109_vm2 = vcmp.lt.f32.partialorder %v1108_v32, 0.0004427343  ;;  %v691_v45 = vrot.slane %v690_v50, 1 }
 0x326   : > { %1327 = vlog2.f32 %v1111_v29  ;;  %v1115_v33 = vadd.f32 1.0, %v1114_v30  ;;  %vm1118_vm5 = vcmp.lt.f32.partialorder %v1117_v34, 0.0004427343  ;;  %v945_v15 = vadd.f32 %v944_v55, %v497_v54 }
 0x327   : > { %v1107_v38 = vmul.f32 %v1322_v25, %v1106_v31  ;;  %v692_v11 = vadd.f32 %v691_v45, %v690_v50 }
 0x328   : > { %v1116_v40 = vmul.f32 %v1324_v26, %v1115_v33  ;;  %v947_v6 = vmin.f32 %v945_v15, 20.0  ;;  %vm946_vm9 = vcmp.gt.f32.partialorder %v945_v15, 20.0 }
 0x329   : > { %v693_v48 = vadd.f32 %v692_v11, %v497_v54 }
 0x32a   : > { %v948_v9 = vmul.f32 1.442695, %v947_v6 }
 0x32b   : > { %v1326_v35 = vpop.eup %1325  ;;  %v695_v2 = vmin.f32 %v693_v48, 20.0  ;;  %vm694_vm14 = vcmp.gt.f32.partialorder %v693_v48, 20.0 }
 0x32c   : > { %v1328_v36 = vpop.eup %1327  ;;  %v1104_v37 = vmul.f32 0.6931472, %v1326_v35  ;;  %1329 = vpow2.f32 %v948_v9 }
 0x32d   : > { %v1113_v39 = vmul.f32 0.6931472, %v1328_v36  ;;  %v696_v5 = vmul.f32 1.442695, %v695_v2 }
 0x32e   : > { %v1110_v41 = vsel %vm1109_vm2, %v1107_v38, %v1104_v37 }
 0x32f   : > { %v1120_v42 = vsel %vm1094_vm4, %v1092_v19, %v1110_v41  ;;  %v1119_v43 = vsel %vm1118_vm5, %v1116_v40, %v1113_v39  ;;  %1331 = vpow2.f32 %v696_v5 }
 0x330   : > { %1138 = vmatmul.f32.vlgmr.msra.gmra.mxu0 %v1120_v42  ;;  %v1121_v44 = vsel %vm1095_vm6, %v1093_v20, %v1119_v43 }
 0x331   : > { %1158 = vmatmul.f32.vlgmr.msra.gmra.mxu1 %v1121_v44 }
 0x332   : > { %v1330_v19 = vpop.eup %1329 }
 0x333   : > { %v950_v21 = vadd.f32 1.0, %v1330_v19  ;;  %v953_v27 = vmul.f32 -0.5, %v1330_v19  ;;  %v956_v31 = vand.u32 2147483647, %v1330_v19 }
 0x335   : > { %v1332_v24 = vpop.eup %1331  ;;  %1333 = vlog2.f32 %v950_v21  ;;  %v954_v29 = vadd.f32 1.0, %v953_v27  ;;  %vm957_vm8 = vcmp.lt.f32.partialorder %v956_v31, 0.0004427343 }
 0x336   : > { %v698_v26 = vadd.f32 1.0, %v1332_v24  ;;  %v701_v32 = vmul.f32 -0.5, %v1332_v24  ;;  %v704_v40 = vand.u32 2147483647, %v1332_v24 }
 0x337   : > { %v955_v36 = vmul.f32 %v1330_v19, %v954_v29 }
 0x338   : > { %v702_v38 = vadd.f32 1.0, %v701_v32  ;;  %vm705_vm10 = vcmp.lt.f32.partialorder %v704_v40, 0.0004427343 }
 0x33a   : > { %v703_v14 = vmul.f32 %v1332_v24, %v702_v38 }
 0x33b   : > { %v1334_v28 = vpop.eup %1333 }
 0x33c   : > { %v952_v33 = vmul.f32 0.6931472, %v1334_v28 }
 0x33e   : > { %v958_v39 = vsel %vm957_vm8, %v955_v36, %v952_v33 }
 0x33f   : > { %v959_v44 = vsel %vm946_vm9, %v945_v15, %v958_v39 }
 0x340   : > { %v1186_v59 = vrot.slane %v959_v44, 7 }
 0x3ad   : > { %v1139_v16 = vpop.f32.mrf.mxu0 }
 0x3ae   : > { %v1159_v12 = vpop.f32.mrf.mxu1 }
 0x3af   : > { %v1160_v47 = vadd.f32 %v1159_v12, %v1139_v16 }
 0x3b1   : > { %v1162_v51 = vmul.f32 %v1160_v47, %v496_v7 }
 0x3b3   : > { %v1163_v10 = vsel %vm685_vm7, %v1162_v51, 0.0 }
 0x3b4   : > { %v1164_v46 = vrot.slane %v1163_v10, 4 }
 0x3b6   : > { %v1165_v3 = vadd.f32 %v1164_v46, %v1163_v10 }
 0x3b8   : > { %v1166_v4 = vrot.slane %v1165_v3, 2 }
 0x3ba   : > { %v1167_v17 = vadd.f32 %v1166_v4, %v1165_v3 }
 0x3bc   : > { %v1168_v18 = vrot.slane %v1167_v17, 1 }
 0x3be   : > { %v1169_v20 = vadd.f32 %v1168_v18, %v1167_v17 }
 0x3c0   : > { %v1170_v22 = vadd.f32 %v1169_v20, %v497_v54 }
 0x3c2   : > { %v1172_v23 = vmin.f32 %v1170_v22, 20.0  ;;  %vm1171_vm13 = vcmp.gt.f32.partialorder %v1170_v22, 20.0 }
 0x3c4   : > { %v1173_v25 = vmul.f32 1.442695, %v1172_v23 }
 0x3c6   : > { %1335 = vpow2.f32 %v1173_v25 }
 0x3c7   : > { %1337 = vlog2.f32 %v698_v26 }
 0x3cc   : > { %v1336_v30 = vpop.eup %1335 }
 0x3cd   : > { %v1175_v34 = vadd.f32 1.0, %v1336_v30  ;;  %v1178_v35 = vmul.f32 -0.5, %v1336_v30  ;;  %v1338_v37 = vpop.eup %1337  ;;  %v1181_v43 = vand.u32 2147483647, %v1336_v30 }
 0x3ce   : > { %v700_v42 = vmul.f32 0.6931472, %v1338_v37 }
 0x3cf   : > { %1339 = vlog2.f32 %v1175_v34  ;;  %v1179_v41 = vadd.f32 1.0, %v1178_v35  ;;  %vm1182_vm11 = vcmp.lt.f32.partialorder %v1181_v43, 0.0004427343 }
 0x3d0   : > { %v706_v58 = vsel %vm705_vm10, %v703_v14, %v700_v42 }
 0x3d1   : > { %v1180_v7 = vmul.f32 %v1336_v30, %v1179_v41  ;;  %v707_v60 = vsel %vm694_vm14, %v693_v48, %v706_v58 }
 0x3d2   : > { %v1192_v56 = vsel %vm1191_vm12, %v707_v60, %v1186_v59 }
 0x3d5   : > { %v1340_v13 = vpop.eup %1339 }
 0x3d6   : > { %v1177_v61 = vmul.f32 0.6931472, %v1340_v13 }
 0x3d8   : > { %v1183_v8 = vsel %vm1182_vm11, %v1180_v7, %v1177_v61 }
 0x3d9   : > { %v1184_v53 = vsel %vm1171_vm13, %v1170_v22, %v1183_v8 }
 0x3da   : > { %v1189_v62 = vrot.slane %v1184_v53, 6 }
 0x3dc   : > { %v1194_v57 = vsel %vm1193_vm15, %v1192_v56, %v1189_v62 }
 0x3dd   : > { %1196 = vst.msk [vmem:[%s431_s28] sm:$0x7] %vm1195_vm0, %v1194_v57 }
 0x3de PF: > { %s22_s21 = sadd.s32 1, %s1347_s21  }
 0x3df   : > { %p19_p4 = scmp.ge.s32.totalorder %s22_s21, 4  }
 0x3e1   :  { %21 = sbr.rel (!%p19_p4) target bundleno = 1 (0x1), region = 101 }

</bundles_post_ra>
